<compile_context>
chip_gen: v7x
topology: tpu7x:2x2x1
jax: 0.10.0
libtpu: 0.0.40
codegen_flags: <defaults>
</compile_context>

<pallas_src>
import functools

import jax
import jax.numpy as jnp
from jax.experimental import pallas as pl
from jax.experimental.pallas import tpu as pltpu


# ----------------------------- fused kernel ---------------------------------
def _cross_conv_kernel(x_ref, w1_ref, s1_ref, b1_ref, w2_ref, s2_ref, b2_ref,
                       out_ref, xs_ref, ys_ref, *, k, shortcut, approx_silu):
    """Fused cv1 (1,k) + BN + SiLU -> cv2 (k,1) + BN + SiLU for one (n, h) tile.

    x_ref  : (H, W, C1)        full image of batch element n (compute dtype)
    w1_ref : (k, C1, c_)       cv1 taps          s1/b1 : (1, c_) folded BN (f32)
    w2_ref : (k, c_, C2)       cv2 taps          s2/b2 : (1, C2) folded BN (f32)
    out_ref: (TH, W, C2)       output tile (f32)
    xs_ref : (TH+2p, W+2p, C1) VMEM staging: input rows with zeroed W halo
    ys_ref : (TH+2p, W, c_)    VMEM cv1 activation with zeroed H halo rows
    """
    pad = k // 2
    H, W, c1 = x_ref.shape
    c_ = w1_ref.shape[-1]
    c2 = w2_ref.shape[-1]
    th = out_ref.shape[0]
    nh = H // th
    nrows = ys_ref.shape[0]                     # th + 2*pad
    cdtype = ys_ref.dtype
    h = pl.program_id(1)

    def silu(v):                                # v is f32
        return v * pl.reciprocal(1.0 + jnp.exp(-v), approx=approx_silu)

    def cv1_rows(src_start, n_src):
        """SiLU(BN1(conv (1,k) along W)) for input rows [src_start, src_start+n_src)."""
        if pad:
            zcol = jnp.zeros((n_src, pad, c1), cdtype)
            xs_ref[0:n_src, 0:pad, :] = zcol                        # left W halo
            xs_ref[0:n_src, pad + W:pad + W + pad, :] = zcol        # right W halo
        xs_ref[0:n_src, pad:pad + W, :] = x_ref[pl.ds(src_start, n_src), :, :]
        acc = jnp.zeros((n_src * W, c_), jnp.float32)
        for t in range(k):                                          # static tap loop
            tap = xs_ref[0:n_src, t:t + W, :].reshape(n_src * W, c1)
            acc = acc + jnp.dot(tap, w1_ref[t],
                                preferred_element_type=jnp.float32)
        y = silu(acc * s1_ref[0] + b1_ref[0])                       # folded BN + SiLU (f32)
        return y.reshape(n_src, W, c_).astype(cdtype)

    zrow = jnp.zeros((pad, W, c_), cdtype) if pad else None

    # ---- cv1 for this tile's rows (+H halo) into ys_ref; zero rows outside image
    if nh == 1:
        slab = cv1_rows(0, H)
        if pad:
            ys_ref[0:pad, :, :] = zrow
            ys_ref[pad + H:nrows, :, :] = zrow
        ys_ref[pad:pad + H, :, :] = slab
    else:
        # clamped source window (always in-bounds, static size); realign on store
        src_start = jnp.clip(h * th - pad, 0, H - nrows)
        slab = cv1_rows(src_start, nrows)

        @pl.when(jnp.logical_and(h > 0, h < nh - 1))
        def _():                                                    # interior tile
            ys_ref[...] = slab

        @pl.when(h == 0)
        def _():                                                    # top boundary
            if pad:
                ys_ref[0:pad, :, :] = zrow
                ys_ref[pad:nrows, :, :] = slab[0:nrows - pad]
            else:
                ys_ref[...] = slab

        @pl.when(h == nh - 1)
        def _():                                                    # bottom boundary
            if pad:
                ys_ref[0:nrows - pad, :, :] = slab[pad:nrows]
                ys_ref[nrows - pad:nrows, :, :] = zrow
            else:
                ys_ref[...] = slab

    # ---- cv2 (k,1) along H from the zero-haloed scratch: static slices only
    acc2 = jnp.zeros((th * W, c2), jnp.float32)
    for t in range(k):
        tap = ys_ref[t:t + th, :, :].reshape(th * W, c_)
        acc2 = acc2 + jnp.dot(tap, w2_ref[t],
                              preferred_element_type=jnp.float32)
    y2 = silu(acc2 * s2_ref[0] + b2_ref[0])
    if shortcut:
        xres = x_ref[pl.ds(h * th, th), :, :].astype(jnp.float32).reshape(th * W, c1)
        y2 = y2 + xres
    out_ref[...] = y2.reshape(th, W, c2).astype(out_ref.dtype)


# ------------------------------- wrappers ------------------------------------
def _default_tile_h(H, pad):
    """Largest divisor of H that is <= 32 and big enough for the halo."""
    best = H
    for t in range(1, min(H, 32) + 1):
        if H % t == 0 and (t >= 2 * pad or t == H):
            best = t
    return best


def cross_conv_nhwc(x_nhwc, params, k=3, shortcut=False, tile_h=None,
                    compute_dtype=jnp.bfloat16):
    """Fused CrossConv forward on NHWC input. Returns NHWC float32."""
    assert k % 2 == 1, "only odd kernel sizes (module default k=3) are supported"
    N, H, W, C1 = x_nhwc.shape
    pad = k // 2
    c_ = params["w1"].shape[-1]
    C2 = params["w2"].shape[-1]
    if shortcut:
        assert C1 == C2, "shortcut requires c1 == c2"

    th = tile_h if tile_h is not None else _default_tile_h(H, pad)
    assert H % th == 0, "tile_h must divide H"
    nh = H // th
    if nh > 1:
        assert th >= 2 * pad, "tile_h too small for the conv halo"
    nrows = th + 2 * pad

    x = x_nhwc.astype(compute_dtype)                    # bf16 feed for the MXU
    w1 = params["w1"].astype(compute_dtype)
    w2 = params["w2"].astype(compute_dtype)
    s1 = params["s1"].astype(jnp.float32).reshape(1, c_)
    b1 = params["b1"].astype(jnp.float32).reshape(1, c_)
    s2 = params["s2"].astype(jnp.float32).reshape(1, C2)
    b2 = params["b2"].astype(jnp.float32).reshape(1, C2)

    kernel = functools.partial(
        _cross_conv_kernel, k=k, shortcut=shortcut,
        approx_silu=(compute_dtype == jnp.bfloat16))

    return pl.pallas_call(
        kernel,
        out_shape=jax.ShapeDtypeStruct((N, H, W, C2), jnp.float32),
        grid=(N, nh),
        in_specs=[
            # full image per batch element; stays VMEM-resident across h-tiles
            pl.BlockSpec((None, H, W, C1), lambda n, h: (n, 0, 0, 0)),
            pl.BlockSpec((k, C1, c_), lambda n, h: (0, 0, 0)),
            pl.BlockSpec((1, c_), lambda n, h: (0, 0)),
            pl.BlockSpec((1, c_), lambda n, h: (0, 0)),
            pl.BlockSpec((k, c_, C2), lambda n, h: (0, 0, 0)),
            pl.BlockSpec((1, C2), lambda n, h: (0, 0)),
            pl.BlockSpec((1, C2), lambda n, h: (0, 0)),
        ],
        out_specs=pl.BlockSpec((None, th, W, C2), lambda n, h: (n, h, 0, 0)),
        scratch_shapes=[
            pltpu.VMEM((nrows, W + 2 * pad, C1), compute_dtype),  # W-padded input rows
            pltpu.VMEM((nrows, W, c_), compute_dtype),            # cv1 out + H halo
        ],
        compiler_params=pltpu.CompilerParams(
            dimension_semantics=("parallel", "parallel")),
    )(x, w1, s1, b1, w2, s2, b2)


def cross_conv(x_nchw, params, k=3, shortcut=False, tile_h=None,
               compute_dtype=jnp.bfloat16):
    """CrossConv forward, PyTorch-compatible NCHW interface."""
    # TODO(synk): NCHW<->NHWC transposes kept only to mirror the PyTorch interface;
    # an NHWC-native caller should use cross_conv_nhwc directly and skip them.
    x = jnp.transpose(x_nchw, (0, 2, 3, 1))
    y = cross_conv_nhwc(x, params, k=k, shortcut=shortcut, tile_h=tile_h,
                        compute_dtype=compute_dtype)
    return jnp.transpose(y, (0, 3, 1, 2))


# ---------------- pure-JAX reference (for correctness check) ----------------
def _ref_conv_bn_silu(x, w, scale, bias, k, axis):
    if axis == 2:  # (1,k) conv along W
        w_hwio = w.reshape(1, k, w.shape[1], w.shape[2])
        padding = ((0, 0), (k // 2, k // 2))
    else:          # (k,1) conv along H
        w_hwio = w.reshape(k, 1, w.shape[1], w.shape[2])
        padding = ((k // 2, k // 2), (0, 0))
    y = jax.lax.conv_general_dilated(
        x, w_hwio, window_strides=(1, 1), padding=padding,
        dimension_numbers=("NHWC", "HWIO", "NHWC"))
    y = y * scale + bias
    return y * jax.nn.sigmoid(y)


def _ref_cross_conv(x_nchw, params, k=3, shortcut=False):
    x = jnp.transpose(x_nchw, (0, 2, 3, 1))
    y = _ref_conv_bn_silu(x, params["w1"], params["s1"], params["b1"], k, axis=2)
    y = _ref_conv_bn_silu(y, params["w2"], params["s2"], params["b2"], k, axis=1)
    if shortcut and x.shape[-1] == y.shape[-1]:
        y = x + y
    return jnp.transpose(y, (0, 3, 1, 2))


# ------------------------- deterministic param setup -------------------------
def make_params(key, c1, c2, k=3, e=1.0, eps=1e-5):
    c_ = int(c2 * e)
    ks = jax.random.split(key, 10)
    # conv weights stored as (k_taps, Cin, Cout)
    w1 = 0.1 * jax.random.normal(ks[0], (k, c1, c_), jnp.float32)
    w2 = 0.1 * jax.random.normal(ks[1], (k, c_, c2), jnp.float32)
    # BatchNorm (eval) params, folded into scale / bias
    g1 = 1.0 + 0.1 * jax.random.normal(ks[2], (c_,), jnp.float32)
    b1 = 0.1 * jax.random.normal(ks[3], (c_,), jnp.float32)
    rm1 = 0.1 * jax.random.normal(ks[4], (c_,), jnp.float32)
    rv1 = jax.random.uniform(ks[5], (c_,), jnp.float32, 0.5, 1.5)
    g2 = 1.0 + 0.1 * jax.random.normal(ks[6], (c2,), jnp.float32)
    b2 = 0.1 * jax.random.normal(ks[7], (c2,), jnp.float32)
    rm2 = 0.1 * jax.random.normal(ks[8], (c2,), jnp.float32)
    rv2 = jax.random.uniform(ks[9], (c2,), jnp.float32, 0.5, 1.5)
    s1 = g1 / jnp.sqrt(rv1 + eps)
    s2 = g2 / jnp.sqrt(rv2 + eps)
    return {"w1": w1, "s1": s1, "b1": b1 - rm1 * s1,
            "w2": w2, "s2": s2, "b2": b2 - rm2 * s2}


if __name__ == "__main__":
    key = jax.random.PRNGKey(0)
    k_x, k_p = jax.random.split(key)

    N, C1, C2, H, W, K = 2, 4, 4, 16, 16, 3
    x = jax.random.normal(k_x, (N, C1, H, W), jnp.float32)   # PyTorch-style NCHW input
    params = make_params(k_p, C1, C2, k=K, e=1.0)

    ref = _ref_cross_conv(x, params, k=K, shortcut=False)

    # bf16 MXU path (default), 4 H-tiles per image -> exercises all halo branches
    out_bf16 = jax.block_until_ready(
        cross_conv(x, params, k=K, shortcut=False, tile_h=4,
                   compute_dtype=jnp.bfloat16))
    # f32 path, same tiling
    out_f32 = jax.block_until_ready(
        cross_conv(x, params, k=K, shortcut=False, tile_h=4,
                   compute_dtype=jnp.float32))
    # single-tile path (nh == 1)
    out_one = jax.block_until_ready(
        cross_conv(x, params, k=K, shortcut=False, tile_h=16,
                   compute_dtype=jnp.float32))
    # shortcut path (c1 == c2), two tiles (boundary-only branches)
    out_sc = jax.block_until_ready(
        cross_conv(x, params, k=K, shortcut=True, tile_h=8,
                   compute_dtype=jnp.float32))
    ref_sc = _ref_cross_conv(x, params, k=K, shortcut=True)

    assert out_bf16.shape == (N, C2, H, W)
    assert jnp.allclose(out_f32, ref, atol=5e-3, rtol=5e-3), "f32 kernel mismatch"
    assert jnp.allclose(out_one, ref, atol=5e-3, rtol=5e-3), "single-tile mismatch"
    assert jnp.allclose(out_sc, ref_sc, atol=5e-3, rtol=5e-3), "shortcut mismatch"
    assert jnp.allclose(out_bf16, ref, atol=3e-2, rtol=3e-2), "bf16 kernel mismatch"

    print("KERNEL_OK")
</pallas_src>

<mosaic_0001>
module attributes {stable_mosaic.version = 11 : i64} {
  func.func @_cross_conv_kernel(%arg0: i32, %arg1: i32, %arg2: memref<1x16x16x4xbf16, #tpu.memory_space<vmem>>, %arg3: memref<3x4x4xbf16, #tpu.memory_space<vmem>>, %arg4: memref<1x4xf32, #tpu.memory_space<vmem>>, %arg5: memref<1x4xf32, #tpu.memory_space<vmem>>, %arg6: memref<3x4x4xbf16, #tpu.memory_space<vmem>>, %arg7: memref<1x4xf32, #tpu.memory_space<vmem>>, %arg8: memref<1x4xf32, #tpu.memory_space<vmem>>, %arg9: memref<1x4x16x4xf32, #tpu.memory_space<vmem>>, %arg10: memref<6x18x4xbf16, #tpu.memory_space<vmem>>, %arg11: memref<6x16x4xbf16, #tpu.memory_space<vmem>>) attributes {dimension_semantics = [#tpu.dimension_semantics<parallel>, #tpu.dimension_semantics<parallel>], iteration_bounds = array<i64: 2, 4>, scalar_prefetch = 0 : i64, scratch_operands = 2 : i64, tpu.core_type = #tpu.core_type<tc>, window_params = [{transform_indices = @transform_0, window_bounds = array<i64: 1, 16, 16, 4>}, {pipeline_mode = #tpu.pipeline_mode<synchronous>, transform_indices = @transform_1, window_bounds = array<i64: 3, 4, 4>}, {pipeline_mode = #tpu.pipeline_mode<synchronous>, transform_indices = @transform_2, window_bounds = array<i64: 1, 4>}, {pipeline_mode = #tpu.pipeline_mode<synchronous>, transform_indices = @transform_3, window_bounds = array<i64: 1, 4>}, {pipeline_mode = #tpu.pipeline_mode<synchronous>, transform_indices = @transform_4, window_bounds = array<i64: 3, 4, 4>}, {pipeline_mode = #tpu.pipeline_mode<synchronous>, transform_indices = @transform_5, window_bounds = array<i64: 1, 4>}, {pipeline_mode = #tpu.pipeline_mode<synchronous>, transform_indices = @transform_6, window_bounds = array<i64: 1, 4>}, {transform_indices = @transform_7, window_bounds = array<i64: 1, 4, 16, 4>}]} {
    %cst = arith.constant 0.000000e+00 : bf16
    %0 = vector.broadcast %cst : bf16 to vector<1x16x4xbf16>
    %c4_i32 = arith.constant 4 : i32
    %1 = arith.muli %arg1, %c4_i32 : i32
    %c1_i32 = arith.constant 1 : i32
    %2 = arith.subi %1, %c1_i32 : i32
    %c0_i32 = arith.constant 0 : i32
    %c10_i32 = arith.constant 10 : i32
    %3 = arith.maxsi %c0_i32, %2 : i32
    %4 = arith.minsi %c10_i32, %3 : i32
    %cst_0 = arith.constant 0.000000e+00 : bf16
    %5 = vector.broadcast %cst_0 : bf16 to vector<6x1x4xbf16>
    %c0 = arith.constant 0 : index
    %c0_1 = arith.constant 0 : index
    %c0_2 = arith.constant 0 : index
    %6 = vector.load %arg10[%c0, %c0_1, %c0_2] : memref<6x18x4xbf16, #tpu.memory_space<vmem>>, vector<6x1x4xbf16>
    tpu.vector_store %arg10[%c0, %c0_1, %c0_2], %5 {strides = array<i32>} : memref<6x18x4xbf16, #tpu.memory_space<vmem>>, vector<6x1x4xbf16>,
    %c0_3 = arith.constant 0 : index
    %c17 = arith.constant 17 : index
    %c0_4 = arith.constant 0 : index
    %7 = vector.load %arg10[%c0_3, %c17, %c0_4] : memref<6x18x4xbf16, #tpu.memory_space<vmem>>, vector<6x1x4xbf16>
    tpu.vector_store %arg10[%c0_3, %c17, %c0_4], %5 {strides = array<i32>} : memref<6x18x4xbf16, #tpu.memory_space<vmem>>, vector<6x1x4xbf16>,
    %c0_5 = arith.constant 0 : index
    %8 = arith.index_cast %4 : i32 to index
    %c0_6 = arith.constant 0 : index
    %c0_7 = arith.constant 0 : index
    %9 = vector.load %arg2[%c0_5, %8, %c0_6, %c0_7] : memref<1x16x16x4xbf16, #tpu.memory_space<vmem>>, vector<1x6x16x4xbf16>
    %10 = vector.shape_cast %9 : vector<1x6x16x4xbf16> to vector<6x16x4xbf16>
    %c0_8 = arith.constant 0 : index
    %c1 = arith.constant 1 : index
    %c0_9 = arith.constant 0 : index
    %11 = vector.load %arg10[%c0_8, %c1, %c0_9] : memref<6x18x4xbf16, #tpu.memory_space<vmem>>, vector<6x16x4xbf16>
    tpu.vector_store %arg10[%c0_8, %c1, %c0_9], %10 {strides = array<i32>} : memref<6x18x4xbf16, #tpu.memory_space<vmem>>, vector<6x16x4xbf16>,
    %cst_10 = arith.constant 0.000000e+00 : f32
    %12 = vector.broadcast %cst_10 : f32 to vector<96x4xf32>
    %c0_11 = arith.constant 0 : index
    %c0_12 = arith.constant 0 : index
    %c0_13 = arith.constant 0 : index
    %13 = vector.load %arg10[%c0_11, %c0_12, %c0_13] : memref<6x18x4xbf16, #tpu.memory_space<vmem>>, vector<6x16x4xbf16>
    %14 = vector.shape_cast %13 : vector<6x16x4xbf16> to vector<96x4xbf16>
    %c0_14 = arith.constant 0 : index
    %c0_15 = arith.constant 0 : index
    %c0_16 = arith.constant 0 : index
    %15 = vector.load %arg3[%c0_14, %c0_15, %c0_16] : memref<3x4x4xbf16, #tpu.memory_space<vmem>>, vector<1x4x4xbf16>
    %16 = vector.shape_cast %15 : vector<1x4x4xbf16> to vector<4x4xbf16>
    %cst_17 = arith.constant dense<0.000000e+00> : vector<96x4xf32>
    %17 = tpu.matmul %14, %16, %cst_17 {dimension_numbers = #tpu.dot_dimension_numbers<[1], [0], [0], [1], [0, 0, 1, 1], [], []>} : vector<96x4xbf16>, vector<4x4xbf16>, vector<96x4xf32> -> vector<96x4xf32>
    %18 = arith.addf %12, %17 : vector<96x4xf32>
    %c0_18 = arith.constant 0 : index
    %c1_19 = arith.constant 1 : index
    %c0_20 = arith.constant 0 : index
    %19 = vector.load %arg10[%c0_18, %c1_19, %c0_20] : memref<6x18x4xbf16, #tpu.memory_space<vmem>>, vector<6x16x4xbf16>
    %20 = vector.shape_cast %19 : vector<6x16x4xbf16> to vector<96x4xbf16>
    %c1_21 = arith.constant 1 : index
    %c0_22 = arith.constant 0 : index
    %c0_23 = arith.constant 0 : index
    %21 = vector.load %arg3[%c1_21, %c0_22, %c0_23] : memref<3x4x4xbf16, #tpu.memory_space<vmem>>, vector<1x4x4xbf16>
    %22 = vector.shape_cast %21 : vector<1x4x4xbf16> to vector<4x4xbf16>
    %cst_24 = arith.constant dense<0.000000e+00> : vector<96x4xf32>
    %23 = tpu.matmul %20, %22, %cst_24 {dimension_numbers = #tpu.dot_dimension_numbers<[1], [0], [0], [1], [0, 0, 1, 1], [], []>} : vector<96x4xbf16>, vector<4x4xbf16>, vector<96x4xf32> -> vector<96x4xf32>
    %24 = arith.addf %18, %23 : vector<96x4xf32>
    %c0_25 = arith.constant 0 : index
    %c2 = arith.constant 2 : index
    %c0_26 = arith.constant 0 : index
    %25 = vector.load %arg10[%c0_25, %c2, %c0_26] : memref<6x18x4xbf16, #tpu.memory_space<vmem>>, vector<6x16x4xbf16>
    %26 = vector.shape_cast %25 : vector<6x16x4xbf16> to vector<96x4xbf16>
    %c2_27 = arith.constant 2 : index
    %c0_28 = arith.constant 0 : index
    %c0_29 = arith.constant 0 : index
    %27 = vector.load %arg3[%c2_27, %c0_28, %c0_29] : memref<3x4x4xbf16, #tpu.memory_space<vmem>>, vector<1x4x4xbf16>
    %28 = vector.shape_cast %27 : vector<1x4x4xbf16> to vector<4x4xbf16>
    %cst_30 = arith.constant dense<0.000000e+00> : vector<96x4xf32>
    %29 = tpu.matmul %26, %28, %cst_30 {dimension_numbers = #tpu.dot_dimension_numbers<[1], [0], [0], [1], [0, 0, 1, 1], [], []>} : vector<96x4xbf16>, vector<4x4xbf16>, vector<96x4xf32> -> vector<96x4xf32>
    %30 = arith.addf %24, %29 : vector<96x4xf32>
    %c0_31 = arith.constant 0 : index
    %c0_32 = arith.constant 0 : index
    %31 = vector.load %arg4[%c0_31, %c0_32] : memref<1x4xf32, #tpu.memory_space<vmem>>, vector<1x4xf32>
    %32 = vector.shape_cast %31 : vector<1x4xf32> to vector<4xf32>
    %33 = vector.shape_cast %32 : vector<4xf32> to vector<1x4xf32>
    %34 = vector.broadcast %33 : vector<1x4xf32> to vector<96x4xf32>
    %35 = arith.mulf %30, %34 : vector<96x4xf32>
    %c0_33 = arith.constant 0 : index
    %c0_34 = arith.constant 0 : index
    %36 = vector.load %arg5[%c0_33, %c0_34] : memref<1x4xf32, #tpu.memory_space<vmem>>, vector<1x4xf32>
    %37 = vector.shape_cast %36 : vector<1x4xf32> to vector<4xf32>
    %38 = vector.shape_cast %37 : vector<4xf32> to vector<1x4xf32>
    %39 = vector.broadcast %38 : vector<1x4xf32> to vector<96x4xf32>
    %40 = arith.addf %35, %39 : vector<96x4xf32>
    %cst_35 = arith.constant 0.000000e+00 : f32
    %41 = vector.broadcast %cst_35 : f32 to vector<96x4xf32>
    %42 = arith.subf %41, %40 : vector<96x4xf32>
    %43 = math.exp %42 : vector<96x4xf32>
    %cst_36 = arith.constant 1.000000e+00 : f32
    %44 = vector.broadcast %cst_36 : f32 to vector<96x4xf32>
    %45 = arith.addf %44, %43 : vector<96x4xf32>
    %46 = tpu.reciprocal %45 {approx = true} : vector<96x4xf32> -> vector<96x4xf32>
    %47 = arith.mulf %40, %46 : vector<96x4xf32>
    %48 = vector.shape_cast %47 : vector<96x4xf32> to vector<6x16x4xf32>
    %49 = arith.truncf %48 : vector<6x16x4xf32> to vector<6x16x4xbf16>
    %c0_i32_37 = arith.constant 0 : i32
    %50 = arith.cmpi sgt, %arg1, %c0_i32_37 : i32
    %c3_i32 = arith.constant 3 : i32
    %51 = arith.cmpi slt, %arg1, %c3_i32 : i32
    %52 = arith.andi %50, %51 : i1
    %53 = arith.extui %52 : i1 to i32
    %c0_i32_38 = arith.constant 0 : i32
    %54 = arith.cmpi ne, %53, %c0_i32_38 : i32
    scf.if %54 {
      %c0_75 = arith.constant 0 : index
      %c0_76 = arith.constant 0 : index
      %c0_77 = arith.constant 0 : index
      %101 = vector.load %arg11[%c0_75, %c0_76, %c0_77] : memref<6x16x4xbf16, #tpu.memory_space<vmem>>, vector<6x16x4xbf16>
      tpu.vector_store %arg11[%c0_75, %c0_76, %c0_77], %49 {strides = array<i32>} : memref<6x16x4xbf16, #tpu.memory_space<vmem>>, vector<6x16x4xbf16>,
    } else {
    }
    %c0_i32_39 = arith.constant 0 : i32
    %55 = arith.cmpi eq, %arg1, %c0_i32_39 : i32
    %56 = arith.extui %55 : i1 to i32
    %c0_i32_40 = arith.constant 0 : i32
    %57 = arith.cmpi ne, %56, %c0_i32_40 : i32
    scf.if %57 {
      %c0_75 = arith.constant 0 : index
      %c0_76 = arith.constant 0 : index
      %c0_77 = arith.constant 0 : index
      %101 = vector.load %arg11[%c0_75, %c0_76, %c0_77] : memref<6x16x4xbf16, #tpu.memory_space<vmem>>, vector<1x16x4xbf16>
      tpu.vector_store %arg11[%c0_75, %c0_76, %c0_77], %0 {strides = array<i32>} : memref<6x16x4xbf16, #tpu.memory_space<vmem>>, vector<1x16x4xbf16>,
      %102 = vector.extract_strided_slice %49 {offsets = [0, 0, 0], sizes = [5, 16, 4], strides = [1, 1, 1]} : vector<6x16x4xbf16> to vector<5x16x4xbf16>
      %c1_78 = arith.constant 1 : index
      %c0_79 = arith.constant 0 : index
      %c0_80 = arith.constant 0 : index
      %103 = vector.load %arg11[%c1_78, %c0_79, %c0_80] : memref<6x16x4xbf16, #tpu.memory_space<vmem>>, vector<5x16x4xbf16>
      tpu.vector_store %arg11[%c1_78, %c0_79, %c0_80], %102 {strides = array<i32>} : memref<6x16x4xbf16, #tpu.memory_space<vmem>>, vector<5x16x4xbf16>,
    } else {
    }
    %c3_i32_41 = arith.constant 3 : i32
    %58 = arith.cmpi eq, %arg1, %c3_i32_41 : i32
    %59 = arith.extui %58 : i1 to i32
    %c0_i32_42 = arith.constant 0 : i32
    %60 = arith.cmpi ne, %59, %c0_i32_42 : i32
    scf.if %60 {
      %101 = vector.extract_strided_slice %49 {offsets = [1, 0, 0], sizes = [5, 16, 4], strides = [1, 1, 1]} : vector<6x16x4xbf16> to vector<5x16x4xbf16>
      %c0_75 = arith.constant 0 : index
      %c0_76 = arith.constant 0 : index
      %c0_77 = arith.constant 0 : index
      %102 = vector.load %arg11[%c0_75, %c0_76, %c0_77] : memref<6x16x4xbf16, #tpu.memory_space<vmem>>, vector<5x16x4xbf16>
      tpu.vector_store %arg11[%c0_75, %c0_76, %c0_77], %101 {strides = array<i32>} : memref<6x16x4xbf16, #tpu.memory_space<vmem>>, vector<5x16x4xbf16>,
      %c5 = arith.constant 5 : index
      %c0_78 = arith.constant 0 : index
      %c0_79 = arith.constant 0 : index
      %103 = vector.load %arg11[%c5, %c0_78, %c0_79] : memref<6x16x4xbf16, #tpu.memory_space<vmem>>, vector<1x16x4xbf16>
      tpu.vector_store %arg11[%c5, %c0_78, %c0_79], %0 {strides = array<i32>} : memref<6x16x4xbf16, #tpu.memory_space<vmem>>, vector<1x16x4xbf16>,
    } else {
    }
    %cst_43 = arith.constant 0.000000e+00 : f32
    %61 = vector.broadcast %cst_43 : f32 to vector<64x4xf32>
    %c0_44 = arith.constant 0 : index
    %c0_45 = arith.constant 0 : index
    %c0_46 = arith.constant 0 : index
    %62 = vector.load %arg11[%c0_44, %c0_45, %c0_46] : memref<6x16x4xbf16, #tpu.memory_space<vmem>>, vector<4x16x4xbf16>
    %63 = vector.shape_cast %62 : vector<4x16x4xbf16> to vector<64x4xbf16>
    %c0_47 = arith.constant 0 : index
    %c0_48 = arith.constant 0 : index
    %c0_49 = arith.constant 0 : index
    %64 = vector.load %arg6[%c0_47, %c0_48, %c0_49] : memref<3x4x4xbf16, #tpu.memory_space<vmem>>, vector<1x4x4xbf16>
    %65 = vector.shape_cast %64 : vector<1x4x4xbf16> to vector<4x4xbf16>
    %cst_50 = arith.constant dense<0.000000e+00> : vector<64x4xf32>
    %66 = tpu.matmul %63, %65, %cst_50 {dimension_numbers = #tpu.dot_dimension_numbers<[1], [0], [0], [1], [0, 0, 1, 1], [], []>} : vector<64x4xbf16>, vector<4x4xbf16>, vector<64x4xf32> -> vector<64x4xf32>
    %67 = arith.addf %61, %66 : vector<64x4xf32>
    %c1_51 = arith.constant 1 : index
    %c0_52 = arith.constant 0 : index
    %c0_53 = arith.constant 0 : index
    %68 = vector.load %arg11[%c1_51, %c0_52, %c0_53] : memref<6x16x4xbf16, #tpu.memory_space<vmem>>, vector<4x16x4xbf16>
    %69 = vector.shape_cast %68 : vector<4x16x4xbf16> to vector<64x4xbf16>
    %c1_54 = arith.constant 1 : index
    %c0_55 = arith.constant 0 : index
    %c0_56 = arith.constant 0 : index
    %70 = vector.load %arg6[%c1_54, %c0_55, %c0_56] : memref<3x4x4xbf16, #tpu.memory_space<vmem>>, vector<1x4x4xbf16>
    %71 = vector.shape_cast %70 : vector<1x4x4xbf16> to vector<4x4xbf16>
    %cst_57 = arith.constant dense<0.000000e+00> : vector<64x4xf32>
    %72 = tpu.matmul %69, %71, %cst_57 {dimension_numbers = #tpu.dot_dimension_numbers<[1], [0], [0], [1], [0, 0, 1, 1], [], []>} : vector<64x4xbf16>, vector<4x4xbf16>, vector<64x4xf32> -> vector<64x4xf32>
    %73 = arith.addf %67, %72 : vector<64x4xf32>
    %c2_58 = arith.constant 2 : index
    %c0_59 = arith.constant 0 : index
    %c0_60 = arith.constant 0 : index
    %74 = vector.load %arg11[%c2_58, %c0_59, %c0_60] : memref<6x16x4xbf16, #tpu.memory_space<vmem>>, vector<4x16x4xbf16>
    %75 = vector.shape_cast %74 : vector<4x16x4xbf16> to vector<64x4xbf16>
    %c2_61 = arith.constant 2 : index
    %c0_62 = arith.constant 0 : index
    %c0_63 = arith.constant 0 : index
    %76 = vector.load %arg6[%c2_61, %c0_62, %c0_63] : memref<3x4x4xbf16, #tpu.memory_space<vmem>>, vector<1x4x4xbf16>
    %77 = vector.shape_cast %76 : vector<1x4x4xbf16> to vector<4x4xbf16>
    %cst_64 = arith.constant dense<0.000000e+00> : vector<64x4xf32>
    %78 = tpu.matmul %75, %77, %cst_64 {dimension_numbers = #tpu.dot_dimension_numbers<[1], [0], [0], [1], [0, 0, 1, 1], [], []>} : vector<64x4xbf16>, vector<4x4xbf16>, vector<64x4xf32> -> vector<64x4xf32>
    %79 = arith.addf %73, %78 : vector<64x4xf32>
    %c0_65 = arith.constant 0 : index
    %c0_66 = arith.constant 0 : index
    %80 = vector.load %arg7[%c0_65, %c0_66] : memref<1x4xf32, #tpu.memory_space<vmem>>, vector<1x4xf32>
    %81 = vector.shape_cast %80 : vector<1x4xf32> to vector<4xf32>
    %82 = vector.shape_cast %81 : vector<4xf32> to vector<1x4xf32>
    %83 = vector.broadcast %82 : vector<1x4xf32> to vector<64x4xf32>
    %84 = arith.mulf %79, %83 : vector<64x4xf32>
    %c0_67 = arith.constant 0 : index
    %c0_68 = arith.constant 0 : index
    %85 = vector.load %arg8[%c0_67, %c0_68] : memref<1x4xf32, #tpu.memory_space<vmem>>, vector<1x4xf32>
    %86 = vector.shape_cast %85 : vector<1x4xf32> to vector<4xf32>
    %87 = vector.shape_cast %86 : vector<4xf32> to vector<1x4xf32>
    %88 = vector.broadcast %87 : vector<1x4xf32> to vector<64x4xf32>
    %89 = arith.addf %84, %88 : vector<64x4xf32>
    %cst_69 = arith.constant 0.000000e+00 : f32
    %90 = vector.broadcast %cst_69 : f32 to vector<64x4xf32>
    %91 = arith.subf %90, %89 : vector<64x4xf32>
    %92 = math.exp %91 : vector<64x4xf32>
    %cst_70 = arith.constant 1.000000e+00 : f32
    %93 = vector.broadcast %cst_70 : f32 to vector<64x4xf32>
    %94 = arith.addf %93, %92 : vector<64x4xf32>
    %95 = tpu.reciprocal %94 {approx = true} : vector<64x4xf32> -> vector<64x4xf32>
    %96 = arith.mulf %89, %95 : vector<64x4xf32>
    %97 = vector.shape_cast %96 : vector<64x4xf32> to vector<4x16x4xf32>
    %c0_71 = arith.constant 0 : index
    %c0_72 = arith.constant 0 : index
    %c0_73 = arith.constant 0 : index
    %c0_74 = arith.constant 0 : index
    %98 = vector.load %arg9[%c0_71, %c0_72, %c0_73, %c0_74] : memref<1x4x16x4xf32, #tpu.memory_space<vmem>>, vector<1x4x16x4xf32>
    %99 = vector.shape_cast %98 : vector<1x4x16x4xf32> to vector<4x16x4xf32>
    %100 = vector.shape_cast %97 : vector<4x16x4xf32> to vector<1x4x16x4xf32>
    tpu.vector_store %arg9[%c0_71, %c0_72, %c0_73, %c0_74], %100 {strides = array<i32>} : memref<1x4x16x4xf32, #tpu.memory_space<vmem>>, vector<1x4x16x4xf32>,
    return
  }
  func.func @transform_0(%arg0: i32, %arg1: i32) -> (i32, i32, i32, i32) {
    %c0_i32 = arith.constant 0 : i32
    %c0_i32_0 = arith.constant 0 : i32
    %c0_i32_1 = arith.constant 0 : i32
    %c0_i32_2 = arith.constant 0 : i32
    return %arg0, %c0_i32, %c0_i32_0, %c0_i32_1 : i32, i32, i32, i32
  }
  func.func @transform_1(%arg0: i32, %arg1: i32) -> (i32, i32, i32) {
    %c0_i32 = arith.constant 0 : i32
    %c0_i32_0 = arith.constant 0 : i32
    %c0_i32_1 = arith.constant 0 : i32
    %c0_i32_2 = arith.constant 0 : i32
    return %c0_i32, %c0_i32_0, %c0_i32_1 : i32, i32, i32
  }
  func.func @transform_2(%arg0: i32, %arg1: i32) -> (i32, i32) {
    %c0_i32 = arith.constant 0 : i32
    %c0_i32_0 = arith.constant 0 : i32
    %c0_i32_1 = arith.constant 0 : i32
    return %c0_i32, %c0_i32_0 : i32, i32
  }
  func.func @transform_3(%arg0: i32, %arg1: i32) -> (i32, i32) {
    %c0_i32 = arith.constant 0 : i32
    %c0_i32_0 = arith.constant 0 : i32
    %c0_i32_1 = arith.constant 0 : i32
    return %c0_i32, %c0_i32_0 : i32, i32
  }
  func.func @transform_4(%arg0: i32, %arg1: i32) -> (i32, i32, i32) {
    %c0_i32 = arith.constant 0 : i32
    %c0_i32_0 = arith.constant 0 : i32
    %c0_i32_1 = arith.constant 0 : i32
    %c0_i32_2 = arith.constant 0 : i32
    return %c0_i32, %c0_i32_0, %c0_i32_1 : i32, i32, i32
  }
  func.func @transform_5(%arg0: i32, %arg1: i32) -> (i32, i32) {
    %c0_i32 = arith.constant 0 : i32
    %c0_i32_0 = arith.constant 0 : i32
    %c0_i32_1 = arith.constant 0 : i32
    return %c0_i32, %c0_i32_0 : i32, i32
  }
  func.func @transform_6(%arg0: i32, %arg1: i32) -> (i32, i32) {
    %c0_i32 = arith.constant 0 : i32
    %c0_i32_0 = arith.constant 0 : i32
    %c0_i32_1 = arith.constant 0 : i32
    return %c0_i32, %c0_i32_0 : i32, i32
  }
  func.func @transform_7(%arg0: i32, %arg1: i32) -> (i32, i32, i32, i32) {
    %c0_i32 = arith.constant 0 : i32
    %c0_i32_0 = arith.constant 0 : i32
    %c0_i32_1 = arith.constant 0 : i32
    return %arg0, %arg1, %c0_i32, %c0_i32_0 : i32, i32, i32, i32
  }
}

</mosaic_0001>

<bundles_post_ra>
// kernel: tpu_custom_call.1
= control target key start
LH: loop header
LB: loop body
LE: loop exit
PB: predicated region body
PF: predicated region fallthrough
CT: control target
= control target key end

     0   :  { %s2204_s24 = smov 0   ;;  %s2206_s25 = smov 0   ;;  %s2751_s0 = inlined_call_operand.vmem [shape: bf16[2,16,16,4], index: 0, kind: input, shape index: {}]   ;;  %s2752_s1 = inlined_call_operand.vmem [shape: bf16[3,4,4], index: 1, kind: input, shape index: {}]   ;;  %s2753_s2 = inlined_call_operand.vmem [shape: f32[1,4], index: 2, kind: input, shape index: {}]   ;;  %s2754_s3 = inlined_call_operand.vmem [shape: f32[1,4], index: 3, kind: input, shape index: {}]   ;;  %s2755_s4 = inlined_call_operand.vmem [shape: bf16[3,4,4], index: 4, kind: input, shape index: {}]   ;;  %s2756_s5 = inlined_call_operand.vmem [shape: f32[1,4], index: 5, kind: input, shape index: {}]   ;;  %s2757_s6 = inlined_call_operand.vmem [shape: f32[1,4], index: 6, kind: input, shape index: {}]   ;;  %s2758_s7 = inlined_call_operand.vmem [shape: f32[2,16,16,4], index: 7, kind: output, shape index: {}]  }
   0x1   :  { %s2208_s26 = smov 0   ;;  %s2210_s27 = smov 0  }
   0x2   :  { %s2212_s28 = smov 0  }
   0x3 LB: > { %s26_s29 = sadd.s32 1, %s2152_s26  ;;  %s29_s30 = sadd.s32 1, %s2156_s27  ;;  %s2160_s28 = sphi %s2212_s28, %s17_s28   ;;  %s2156_s27 = sphi %s2210_s27, %s2775_s27   ;;  %s2152_s26 = sphi %s2208_s26, %s2774_s26   ;;  %s2148_s25 = sphi %s2206_s25, %s2773_s25   ;;  %s2144_s24 = sphi %s2204_s24, %s2772_s24  }
   0x4   : > { %p27_p0 = scmp.ge.s32.totalorder %s26_s29, 4  ;;  %p1752_p1 = scmp.ge.s32.totalorder %s2160_s28, 1 }
   0x5   : > { %p251_p2 = scmp.lt.s32.totalorder %s2160_s28, 9 }
   0x6   : > { %s2777_s29 = smov (%p27_p0, %s26_s29), 0  ;;  %s2779_s30 = smov (!%p27_p0, %s29_s30), %s2156_s27 }
   0x7   : > { %p252_p3 = pnand %p1752_p1, %p251_p2  ;;  %p31_p4 = scmp.ge.s32.totalorder %s2779_s30, 2 }
   0x8   : > { %v1768_v0 = vld [vmem:[%s2752_s1 + $0x2] sm:$0x3] (!%p252_p3)  ;;  %vm739_vm0 = vcmask (!%p252_p3), 1041408   ;;  %p288_p5 = scmp.lt.s32.totalorder (!%p252_p3), %s2148_s25, 1  ;;  %s1755_s10 = sshll.u32 (!%p252_p3), %s2144_s24, 2  ;;  %vm311_vm1 = vcmask (!%p252_p3), 24576  }
   0x9   : > { %s2781_s30 = smov (%p31_p4, %s2779_s30), 0  ;;  %255 = sbr.rel (%p252_p3) target bundleno = 682 (0x2aa), region = 48 }
   0xa   : > { %1988 = vmatprep.subr.msk.bf16.mxu0 (!%p252_p3), %vm739_vm0, %v1768_v0  ;;  %v741_v1 = vsel (!%p252_p3), %vm739_vm0, %v1768_v0, 0  ;;  %p296_p6 = scmp.lt.s32.totalorder (!%p252_p3), %s1755_s10, 15  ;;  %s2242_s11 = sadd.s32 (!%p252_p3), 4294967295, %s1755_s10  ;;  %vm312_vm2 = vsmask.f32 (!%p252_p3), 256  ;;  %1989 = vmatprep.subr.msk.bf16.mxu1 (!%p252_p3), %vm739_vm0, %v1768_v0  ;;  %vm489_vm7 = vcmask (!%p252_p3), 27648  }
   0xb   : > { %1875 = vmatpush3.bf16.msra.mxu0 (!%p252_p3), %v741_v1  ;;  %vm2249_vm3 = vmand (!%p252_p3), %vm311_vm1, %vm312_vm2  ;;  %v314_v3 = vld [vmem:[#allocation2] sm:$0x1] (!%p252_p3)  ;;  %vm332_vm4 = vsmask.f32 (!%p252_p3), 7938  ;;  %1947 = vmatpush3.bf16.msra.mxu1 (!%p252_p3), %v741_v1  ;;  %v334_v6 = vld [vmem:[#allocation2 + $0x8] sm:$0x1] (!%p252_p3) }
   0xc   : > { %v315_v4 = vsel (!%p252_p3), %vm2249_vm3, 0, %v314_v3  ;;  %vm2257_vm5 = vmand (!%p252_p3), %vm311_vm1, %vm332_vm4  ;;  %v2268_v8 = vld [vmem:[%s2752_s1] sm:$0x3] (!%p252_p3)  ;;  %p307_p7 = scmp.gt.s32.totalorder (!%p252_p3), %s2242_s11, 0  ;;  %v317_v9 = vld [vmem:[#allocation2 + $0xc] sm:$0x1] (!%p252_p3) }
   0xd   : > { %316 = vst [vmem:[#allocation2] sm:$0x1] (!%p252_p3), %v315_v4  ;;  %v335_v7 = vsel (!%p252_p3), %vm2257_vm5, 0, %v334_v6  ;;  %1990 = vmatprep.subr.msk.bf16.mxu0 (!%p252_p3), %vm739_vm0, %v2268_v8  ;;  %v337_v10 = vld [vmem:[#allocation2 + $0x14] sm:$0x1] (!%p252_p3)  ;;  %p1761_p8 = scmp.lt.s32.totalorder (!%p252_p3), %s2242_s11, 10  ;;  %vm2320_vm9 = vmand (!%p252_p3), %vm489_vm7, %vm332_vm4 }
   0xe   : > { %336 = vst [vmem:[#allocation2 + $0x8] sm:$0x1] (!%p252_p3), %v335_v7  ;;  %v318_v11 = vsel (!%p252_p3), %vm2249_vm3, 0, %v317_v9  ;;  %v338_v12 = vsel (!%p252_p3), %vm2257_vm5, 0, %v337_v10  ;;  %v320_v13 = vld [vmem:[#allocation2 + $0x18] sm:$0x1] (!%p252_p3) }
   0xf   : > { %319 = vst [vmem:[#allocation2 + $0xc] sm:$0x1] (!%p252_p3), %v318_v11  ;;  %339 = vst [vmem:[#allocation2 + $0x14] sm:$0x1] (!%p252_p3), %v338_v12  ;;  %v323_v14 = vld [vmem:[#allocation2 + $0x24] sm:$0x1] (!%p252_p3) }
  0x10   : > { %s2783_s25 = smov (!%p288_p5, %s2148_s25), 1  ;;  %s2785_s10 = smov (!%p296_p6, %s1755_s10), 15  ;;  %v321_v15 = vsel %vm2249_vm3, 0, %v320_v13  ;;  %v324_v16 = vsel %vm2249_vm3, 0, %v323_v14  ;;  %v326_v17 = vld [vmem:[#allocation2 + $0x30] sm:$0x1] }
  0x11   : > { %s1757_s12 = sshll.u32 %s2783_s25, 5  ;;  %s1834_s13 = sshll.u32 %s2783_s25, 7  ;;  %322 = vst [vmem:[#allocation2 + $0x18] sm:$0x1] %v321_v15  ;;  %325 = vst [vmem:[#allocation2 + $0x24] sm:$0x1] %v324_v16 }
  0x12   : > { %s1756_s14 = sshll.u32 %s2785_s10, 1  ;;  %s292_s8 = scalar_lea.vmem %s2751_s0, %s1834_s13  ;;  %v327_v18 = vsel %vm2249_vm3, 0, %v326_v17  ;;  %v329_v19 = vld [vmem:[#allocation2 + $0x3c] sm:$0x1]  ;;  %v340_v20 = vld [vmem:[#allocation2 + $0x20] sm:$0x1] }
  0x13   : > { %s300_s17 = sadd.s32 %s1757_s12, %s1756_s14  ;;  %328 = vst [vmem:[#allocation2 + $0x30] sm:$0x1] %v327_v18  ;;  %v330_v21 = vsel %vm2249_vm3, 0, %v329_v19  ;;  %v341_v22 = vsel %vm2257_vm5, 0, %v340_v20  ;;  %v343_v23 = vld [vmem:[#allocation2 + $0x2c] sm:$0x1] }
  0x14   : > { %s1758_s18 = sshll.u32 %s300_s17, 3  ;;  %331 = vst [vmem:[#allocation2 + $0x3c] sm:$0x1] %v330_v21  ;;  %342 = vst [vmem:[#allocation2 + $0x20] sm:$0x1] %v341_v22  ;;  %v344_v25 = vsel %vm2257_vm5, 0, %v343_v23 }
  0x15   : > { %s2281_s21 = scalar_lea.vmem %s2758_s7, %s1758_s18  ;;  %v346_v24 = vld [vmem:[#allocation2 + $0x38] sm:$0x1]  ;;  %v349_v27 = vld [vmem:[#allocation2 + $0x44] sm:$0x1]  ;;  %vm367_vm6 = vsmask.f32 4368 }
  0x16   : > { %s308_s22 = scalar_select %p307_p7, %s2242_s11, 0  ;;  %v347_v26 = vsel %vm2257_vm5, 0, %v346_v24  ;;  %345 = vst [vmem:[#allocation2 + $0x2c] sm:$0x1] %v344_v25  ;;  %v350_v28 = vsel %vm2257_vm5, 0, %v349_v27  ;;  %vm2313_vm8 = vmor %vm312_vm2, %vm367_vm6  ;;  %vm720_vm13 = vcmask 31744  }
  0x17   : > { %348 = vst [vmem:[#allocation2 + $0x38] sm:$0x1] %v347_v26  ;;  %351 = vst [vmem:[#allocation2 + $0x44] sm:$0x1] %v350_v28  ;;  %v491_v37 = vld [vmem:[#allocation2] sm:$0xf] }
  0x18   : > { %s2787_s22 = smov (!%p1761_p8, %s308_s22), 10  ;;  %v496_v45 = vld [vmem:[#allocation2 + $0x8] sm:$0x1]  ;;  %v499_v50 = vld [vmem:[#allocation2 + $0xc] sm:$0xf]  ;;  %vm974_vm14 = vcmask 1042432  }
  0x19   : > { %s1837_s9 = sshll.u32 %s2787_s22, 3  ;;  %v503_v57 = vld [vmem:[#allocation2 + $0x14] sm:$0x1]  ;;  %v506_v11 = vld [vmem:[#allocation2 + $0x18] sm:$0xf]  ;;  %vm975_vm15 = vcmask 1046532  }
  0x1a   : > { %s2303_s10 = scalar_lea.vmem %s292_s8, %s1837_s9  ;;  %vm553_vm10 = vsmask.f32 3328  ;;  %v513_v26 = vld [vmem:[#allocation2 + $0x24] sm:$0xf]  ;;  %vm554_vm11 = vsmask.f32 7440  ;;  %vm2500_vm1 = vmor %vm974_vm14, %vm975_vm15 }
  0x1b   : > { %v355_v29 = vld [vmem:[%s2303_s10] sm:$0xf]  ;;  %v356_v30 = vld [vmem:[%s2303_s10 + $0x4] sm:$0xf]  ;;  %v357_v31 = vld [vmem:[%s2303_s10 + $0x8] sm:$0xf] }
  0x1c   : > { %v370_v32 = vshrl.u32 %v355_v29, 16  ;;  %v373_v33 = vshll.u32 %v355_v29, 16  ;;  %v378_v34 = vshrl.u32 %v356_v30, 16  ;;  %v381_v35 = vshll.u32 %v356_v30, 16  ;;  %v358_v36 = vld [vmem:[%s2303_s10 + $0xc] sm:$0xf]  ;;  %vm2387_vm12 = vmor %vm553_vm10, %vm554_vm11 }
  0x1d   : > { %v387_v38 = vshrl.u32 %v357_v31, 16  ;;  %v390_v39 = vshll.u32 %v357_v31, 16  ;;  %v395_v40 = vshrl.u32 %v358_v36, 16  ;;  %v398_v41 = vshll.u32 %v358_v36, 16  ;;  %v359_v46 = vld [vmem:[%s2303_s10 + $0x10] sm:$0xf] }
  0x1e   : > { %v372_v43 = vrot.slane %v370_v32, 7  ;;  %v380_v44 = vrot.slane %v378_v34, 7  ;;  %v404_v51 = vshrl.u32 %v359_v46, 16  ;;  %v407_v52 = vshll.u32 %v359_v46, 16  ;;  %v360_v58 = vld [vmem:[%s2303_s10 + $0x14] sm:$0xf] }
  0x1f   : > { %v389_v48 = vrot.slane %v387_v38, 7  ;;  %v397_v49 = vrot.slane %v395_v40, 7  ;;  %v361_v63 = vld [vmem:[%s2303_s10 + $0x18] sm:$0xf]  ;;  %v362_v5 = vld [vmem:[%s2303_s10 + $0x1c] sm:$0xf] }
  0x20   : > { %v375_v53 = vor.u32 %v373_v33, %v372_v43  ;;  %v376_v54 = vrot.slane %v372_v43, 4  ;;  %v383_v55 = vor.u32 %v381_v35, %v380_v44  ;;  %v385_v56 = vrot.slane %v380_v44, 4  ;;  %v363_v20 = vld [vmem:[%s2303_s10 + $0x20] sm:$0xf]  ;;  %v2347_v23 = vld [vmem:[%s2303_s10 + $0x24] sm:$0xf] }
  0x21   : > { %v392_v59 = vor.u32 %v390_v39, %v389_v48  ;;  %v393_v60 = vrot.slane %v389_v48, 4  ;;  %v400_v61 = vor.u32 %v398_v41, %v397_v49  ;;  %v402_v62 = vrot.slane %v397_v49, 4  ;;  %p1269_p9 = scmp.gt.s32.totalorder %s2144_s24, 0  ;;  %p1270_p10 = scmp.lt.s32.totalorder %s2144_s24, 3 }
  0x22   : > { %v384_v0 = vsel %vm2313_vm8, %v376_v54, %v383_v55  ;;  %v492_v1 = vsel %vm2320_vm9, %v375_v53, %v491_v37  ;;  %v497_v3 = vsel %vm2249_vm3, %v385_v56, %v496_v45  ;;  %v406_v4 = vrot.slane %v404_v51, 7 }
  0x23   : > { %493 = vst [vmem:[#allocation2] sm:$0xf] %v492_v1  ;;  %495 = vst.msk [vmem:[#allocation2 + $0x4] sm:$0xf] %vm489_vm7, %v384_v0  ;;  %v401_v6 = vsel %vm2313_vm8, %v393_v60, %v400_v61  ;;  %v500_v7 = vsel %vm2320_vm9, %v392_v59, %v499_v50  ;;  %v504_v9 = vsel %vm2249_vm3, %v402_v62, %v503_v57  ;;  %v412_v10 = vshrl.u32 %v360_v58, 16  ;;  %p2564_p11 = pnand %p1270_p10, %p1269_p9 }
  0x24   : > { %498 = vst [vmem:[#allocation2 + $0x8] sm:$0x1] %v497_v3  ;;  %501 = vst [vmem:[#allocation2 + $0xc] sm:$0xf] %v500_v7  ;;  %v409_v12 = vor.u32 %v407_v52, %v406_v4  ;;  %v410_v13 = vrot.slane %v406_v4, 4  ;;  %v415_v14 = vshll.u32 %v360_v58, 16 }
  0x25   : > { %502 = vst.msk [vmem:[#allocation2 + $0x10] sm:$0xf] %vm489_vm7, %v401_v6  ;;  %505 = vst [vmem:[#allocation2 + $0x14] sm:$0x1] %v504_v9  ;;  %v421_v15 = vshrl.u32 %v361_v63, 16  ;;  %v2341_v16 = vrot.slane %v412_v10, 7 }
  0x26   : > { %v424_v17 = vshll.u32 %v361_v63, 16  ;;  %v429_v18 = vshrl.u32 %v362_v5, 16  ;;  %v432_v19 = vshll.u32 %v362_v5, 16  ;;  %v507_v21 = vsel %vm2320_vm9, %v409_v12, %v506_v11  ;;  %v365_v62 = vld [vmem:[%s2303_s10 + $0x28] sm:$0xf] }
  0x27   : > { %v423_v22 = vrot.slane %v421_v15, 7  ;;  %v417_v24 = vor.u32 %v415_v14, %v2341_v16  ;;  %508 = vst [vmem:[#allocation2 + $0x18] sm:$0xf] %v507_v21  ;;  %v438_v29 = vshrl.u32 %v363_v20, 16  ;;  %v441_v32 = vshll.u32 %v363_v20, 16 }
  0x28   : > { %v2350_v25 = vrot.slane %v429_v18, 7  ;;  %v446_v33 = vshrl.u32 %v2347_v23, 16  ;;  %v449_v7 = vshll.u32 %v2347_v23, 16  ;;  %v455_v12 = vshrl.u32 %v365_v62, 16  ;;  %v520_v21 = vld [vmem:[#allocation2 + $0x30] sm:$0xf] }
  0x29   : > { %v426_v27 = vor.u32 %v424_v17, %v423_v22  ;;  %v427_v28 = vrot.slane %v423_v22, 4  ;;  %v418_v30 = vsel %vm2313_vm8, %v410_v13, %v417_v24  ;;  %v440_v49 = vrot.slane %v438_v29, 7  ;;  %v366_v24 = vld [vmem:[%s2303_s10 + $0x2c] sm:$0xf] }
  0x2a   : > { %v434_v31 = vor.u32 %v432_v19, %v2350_v25  ;;  %v2356_v34 = vld [vmem:[#allocation2] sm:$0xf]  ;;  %v2358_v35 = vld [vmem:[#allocation2 + $0x4] sm:$0xf]  ;;  %509 = vst.msk [vmem:[#allocation2 + $0x1c] sm:$0xf] %vm489_vm7, %v418_v30 }
  0x2b   : > { %v2360_v36 = vld [vmem:[#allocation2 + $0x8] sm:$0x1]  ;;  %v514_v37 = vsel %vm2320_vm9, %v426_v27, %v513_v26  ;;  %v557_v38 = vshrl.u32 %v2356_v34, 16  ;;  %v560_v39 = vshll.u32 %v2356_v34, 16  ;;  %v566_v40 = vshll.u32 %v2358_v35, 16 }
  0x2c   : > { %v570_v41 = vshrl.u32 %v2358_v35, 16  ;;  %v2369_v43 = vld [vmem:[#allocation2 + $0xc] sm:$0xf]  ;;  %515 = vst [vmem:[#allocation2 + $0x24] sm:$0xf] %v514_v37  ;;  %v576_v44 = vshll.u32 %v2360_v36, 16  ;;  %v435_v48 = vsel %vm2313_vm8, %v427_v28, %v434_v31  ;;  %v443_v10 = vor.u32 %v441_v32, %v440_v49 }
  0x2d   : > { %v2372_v45 = vld [vmem:[#allocation2 + $0x10] sm:$0xf]  ;;  %v2374_v46 = vld [vmem:[#allocation2 + $0x14] sm:$0x1]  ;;  %v559_v50 = vrot.slane %v557_v38, 4  ;;  %v562_v51 = vrot.slane %v560_v39, 5  ;;  %v1781_v27 = vcombine.low %v2356_v34, %v2358_v35 }
  0x2e   : > { %v568_v52 = vrot.slane %v566_v40, 5  ;;  %v572_v53 = vrot.slane %v570_v41, 4  ;;  %516 = vst.msk [vmem:[#allocation2 + $0x28] sm:$0xf] %vm489_vm7, %v435_v48  ;;  %v578_v54 = vrot.slane %v576_v44, 5  ;;  %v581_v55 = vshrl.u32 %v2369_v43, 16 }
  0x2f   : > { %v584_v56 = vshll.u32 %v2369_v43, 16  ;;  %v590_v57 = vshll.u32 %v2372_v45, 16  ;;  %v563_v58 = vor.u32 %v562_v51, %v559_v50  ;;  %v594_v60 = vshrl.u32 %v2372_v45, 16  ;;  %v527_v34 = vld [vmem:[#allocation2 + $0x3c] sm:$0xf] }
  0x30   : > { %v573_v59 = vor.u32 %v572_v53, %v568_v52  ;;  %v600_v61 = vshll.u32 %v2374_v46, 16  ;;  %v583_v0 = vrot.slane %v581_v55, 4  ;;  %v2392_v11 = vrot.slane %v446_v33, 7  ;;  %v1799_v40 = vld [vmem:[%s2752_s1 + $0x4] sm:$0x3] }
  0x31   : > { %v586_v1 = vrot.slane %v584_v56, 5  ;;  %v592_v3 = vrot.slane %v590_v57, 5  ;;  %v564_v4 = vrot.slane %v563_v58, 4  ;;  %v596_v6 = vrot.slane %v594_v60, 4  ;;  %v2422_v50 = vld [vmem:[#allocation2 + $0x18] sm:$0xf] }
  0x32   : > { %v574_v5 = vrot.slane %v573_v59, 4  ;;  %v602_v17 = vrot.slane %v600_v61, 5  ;;  %v444_v20 = vrot.slane %v440_v49, 4  ;;  %v873_v26 = vsel %vm739_vm0, %v2268_v8, 0  ;;  %v510_v49 = vld [vmem:[#allocation2 + $0x20] sm:$0x1] }
  0x33   : > { %v587_v9 = vor.u32 %v586_v1, %v583_v0  ;;  %v569_v13 = vsel %vm2387_vm12, %v564_v4, %v568_v52  ;;  %v597_v15 = vor.u32 %v596_v6, %v592_v3  ;;  %v451_v28 = vor.u32 %v449_v7, %v2392_v11  ;;  %v2411_v37 = vld [vmem:[#allocation2 + $0x24] sm:$0xf]  ;;  %v517_v58 = vld [vmem:[#allocation2 + $0x2c] sm:$0x1]  ;;  %v2434_v59 = vld [vmem:[#allocation2 + $0x1c] sm:$0xf] }
  0x34   : > { %v579_v14 = vsel %vm2387_vm12, %v574_v5, %v578_v54  ;;  %v521_v30 = vsel %vm2320_vm9, %v443_v10, %v520_v21  ;;  %v457_v31 = vrot.slane %v455_v12, 7  ;;  %v458_v32 = vshll.u32 %v365_v62, 16 }
  0x35   : > { %v1769_v18 = vcombine.low %v569_v13, %v579_v14  ;;  %v588_v19 = vrot.slane %v587_v9, 4  ;;  %v598_v22 = vrot.slane %v597_v15, 4  ;;  %v452_v38 = vsel %vm2313_vm8, %v444_v20, %v451_v28  ;;  %522 = vst [vmem:[#allocation2 + $0x30] sm:$0xf] %v521_v30  ;;  %v2438_v62 = vld [vmem:[#allocation2 + $0x28] sm:$0xf] }
  0x36   : > { %v463_v8 = vshrl.u32 %v366_v24, 16  ;;  %v466_v39 = vshll.u32 %v366_v24, 16  ;;  %v629_v41 = vshrl.u32 %v2411_v37, 16  ;;  %v632_v44 = vshll.u32 %v2411_v37, 16  ;;  %523 = vst.msk [vmem:[#allocation2 + $0x34] sm:$0xf] %vm489_vm7, %v452_v38 }
  0x37   : > { %1876 = vmatprep.mubr.msk.bf16.mxu0 %vm720_vm13, %v1769_v18  ;;  %v593_v23 = vsel %vm2387_vm12, %v588_v19, %v592_v3  ;;  %v603_v29 = vsel %vm2387_vm12, %v598_v22, %v602_v17  ;;  %v460_v48 = vor.u32 %v458_v32, %v457_v31  ;;  %v461_v51 = vrot.slane %v457_v31, 4 }
  0x38   : > { %v1770_v33 = vcombine.low %v593_v23, %v603_v29  ;;  %v2424_v52 = vrot.slane %v463_v8, 7  ;;  %v419_v53 = vrot.slane %v2341_v16, 4  ;;  %v436_v54 = vrot.slane %v2350_v25, 4  ;;  %v956_v23 = vld [vmem:[#allocation2] sm:$0xe] }
  0x39   : > { %v528_v55 = vsel %vm2320_vm9, %v460_v48, %v527_v34  ;;  %v605_v56 = vshrl.u32 %v2422_v50, 16  ;;  %v631_v60 = vrot.slane %v629_v41, 4  ;;  %v634_v16 = vrot.slane %v632_v44, 5 }
  0x3a   : > { %1877 = vmatmul.mubr.msk.bf16.vlgmr.msra.gmra.mrb[0].mxu0 %vm720_vm13, %v1770_v33  ;;  %v468_v57 = vor.u32 %v466_v39, %v2424_v52  ;;  %529 = vst [vmem:[#allocation2 + $0x3c] sm:$0xf] %v528_v55  ;;  %v511_v61 = vsel %vm2249_vm3, %v419_v53, %v510_v49  ;;  %v608_v0 = vshll.u32 %v2422_v50, 16  ;;  %v614_v1 = vshll.u32 %v2434_v59, 16 }
  0x3b   : > { %1889 = vmatpush3.bf16.msra.mxu0 %v873_v26  ;;  %1890 = vmatprep.mubr.msk.bf16.mxu0 %vm720_vm13, %v1781_v27  ;;  %512 = vst [vmem:[#allocation2 + $0x20] sm:$0x1] %v511_v61  ;;  %v607_v25 = vrot.slane %v605_v56, 4  ;;  %v642_v3 = vshrl.u32 %v2438_v62, 16  ;;  %v618_v4 = vshrl.u32 %v2434_v59, 16  ;;  %v518_v5 = vsel %vm2249_vm3, %v436_v54, %v517_v58 }
  0x3c   : > { %1991 = vmatprep.subr.msk.bf16.mxu0 %vm739_vm0, %v1799_v40  ;;  %v469_v47 = vsel %vm2313_vm8, %v461_v51, %v468_v57  ;;  %v638_v6 = vshll.u32 %v2438_v62, 16  ;;  %v610_v7 = vrot.slane %v608_v0, 5  ;;  %v616_v42 = vrot.slane %v614_v1, 5  ;;  %519 = vst [vmem:[#allocation2 + $0x2c] sm:$0x1] %v518_v5 }
  0x3d   : > { %530 = vst.msk [vmem:[#allocation2 + $0x40] sm:$0xf] %vm489_vm7, %v469_v47  ;;  %v1782_v9 = vcombine.low %v2369_v43, %v2372_v45  ;;  %v620_v10 = vrot.slane %v618_v4, 4  ;;  %v1783_v12 = vcombine.low %v2422_v50, %v2434_v59  ;;  %v2454_v13 = vld [vmem:[#allocation2 + $0x30] sm:$0xf]  ;;  %v635_v15 = vor.u32 %v634_v16, %v631_v60 }
  0x3e   : > { %v611_v14 = vor.u32 %v610_v7, %v607_v25  ;;  %v640_v17 = vrot.slane %v638_v6, 5  ;;  %v653_v18 = vshrl.u32 %v2454_v13, 16  ;;  %v656_v19 = vshll.u32 %v2454_v13, 16  ;;  %v524_v27 = vld [vmem:[#allocation2 + $0x38] sm:$0x1] }
  0x3f   : > { %v621_v20 = vor.u32 %v620_v10, %v616_v42  ;;  %v644_v21 = vrot.slane %v642_v3, 4  ;;  %v982_v22 = vrot.slane %v2360_v36, 5  ;;  %v1058_v43 = vsel %vm739_vm0, %v1799_v40, 0  ;;  %v2463_v29 = vld [vmem:[#allocation2 + $0x34] sm:$0xf] }
  0x40   : > { %v453_v24 = vrot.slane %v2392_v11, 4  ;;  %v612_v26 = vrot.slane %v611_v14, 4  ;;  %v1784_v28 = vcombine.low %v2411_v37, %v2438_v62  ;;  %v470_v30 = vrot.slane %v2424_v52, 4  ;;  %v531_v57 = vld [vmem:[#allocation2 + $0x44] sm:$0x1] }
  0x41   : > { %v979_v31 = vrot.slane %v2358_v35, 5  ;;  %v645_v33 = vor.u32 %v644_v21, %v640_v17  ;;  %v666_v38 = vshrl.u32 %v2463_v29, 16  ;;  %v2471_v11 = vld [vmem:[#allocation2 + $0x3c] sm:$0xf]  ;;  %v622_v8 = vrot.slane %v621_v20, 4 }
  0x42   : > { %v2467_v32 = vld [vmem:[#allocation2 + $0x20] sm:$0x1]  ;;  %v636_v34 = vrot.slane %v635_v15, 4  ;;  %v655_v37 = vrot.slane %v653_v18, 4  ;;  %v658_v40 = vrot.slane %v656_v19, 5  ;;  %v677_v35 = vshrl.u32 %v2471_v11, 16 }
  0x43   : > { %v624_v39 = vshll.u32 %v2467_v32, 16  ;;  %v680_v41 = vshll.u32 %v2471_v11, 16  ;;  %v2477_v44 = vld [vmem:[#allocation2 + $0x2c] sm:$0x1]  ;;  %v617_v48 = vsel %vm2387_vm12, %v612_v26, %v616_v42  ;;  %v646_v50 = vrot.slane %v645_v33, 4 }
  0x44   : > { %v648_v51 = vshll.u32 %v2477_v44, 16  ;;  %v1785_v52 = vcombine.low %v2454_v13, %v2463_v29  ;;  %v2484_v53 = vld [vmem:[#allocation2 + $0x40] sm:$0xf]  ;;  %v1793_v54 = vrot.slane %v956_v23, 9  ;;  %v981_v55 = vrot.slane %v979_v31, 4 }
  0x45   : > { %v626_v49 = vrot.slane %v624_v39, 5  ;;  %v525_v56 = vsel %vm2249_vm3, %v453_v24, %v524_v27  ;;  %v690_v58 = vshrl.u32 %v2484_v53, 16  ;;  %v641_v16 = vsel %vm2387_vm12, %v636_v34, %v640_v17  ;;  %v957_v13 = vld [vmem:[#allocation2 + $0xc] sm:$0xe] }
  0x46   : > { %1891 = vmatmul.mubr.msk.bf16.vlgmr.msra.gmra.mrb[0].mxu0 %vm720_vm13, %v1782_v9  ;;  %v650_v61 = vrot.slane %v648_v51, 5  ;;  %526 = vst [vmem:[#allocation2 + $0x38] sm:$0x1] %v525_v56  ;;  %v679_v47 = vrot.slane %v677_v35, 4  ;;  %v682_v25 = vrot.slane %v680_v41, 5  ;;  %v662_v1 = vshll.u32 %v2463_v29, 16 }
  0x47   : > { %1903 = vmatpush3.bf16.msra.mxu0 %v1058_v43  ;;  %1894 = vmatprep.mubr.msk.bf16.mxu0 %vm720_vm13, %v1783_v12  ;;  %v627_v60 = vsel %vm2387_vm12, %v622_v8, %v626_v49  ;;  %v659_v4 = vor.u32 %v658_v40, %v655_v37  ;;  %v668_v5 = vrot.slane %v666_v38, 4  ;;  %v532_v6 = vsel %vm2249_vm3, %v470_v30, %v531_v57 }
  0x48   : > { %v1771_v0 = vcombine.low %v617_v48, %v627_v60  ;;  %v651_v3 = vsel %vm2387_vm12, %v646_v50, %v650_v61  ;;  %v664_v9 = vrot.slane %v662_v1, 5  ;;  %533 = vst [vmem:[#allocation2 + $0x44] sm:$0x1] %v532_v6  ;;  %v686_v10 = vshll.u32 %v2484_v53, 16 }
  0x49   : > { %v1772_v42 = vcombine.low %v641_v16, %v651_v3  ;;  %v986_v12 = vrot.slane %v2372_v45, 5  ;;  %v692_v2 = vrot.slane %v690_v58, 4  ;;  %v683_v15 = vor.u32 %v682_v25, %v679_v47  ;;  %v958_v45 = vld [vmem:[#allocation2 + $0x18] sm:$0xe] }
  0x4a   : > { %1880 = vmatprep.mubr.msk.bf16.mxu1 %vm720_vm13, %v1771_v0  ;;  %v669_v14 = vor.u32 %v668_v5, %v664_v9  ;;  %v688_v17 = vrot.slane %v686_v10, 5  ;;  %v980_v18 = vsel %vm2500_vm1, %v1793_v54, %v979_v31  ;;  %v983_v19 = vsel %vm2500_vm1, %v981_v55, %v982_v22 }
  0x4b   : > { %1881 = vmatmul.mubr.msk.bf16.vlgmr.msra.gmra.mrb[0].mxu1 %vm720_vm13, %v1772_v42  ;;  %v993_v20 = vrot.slane %v2434_v59, 5  ;;  %v660_v21 = vrot.slane %v659_v4, 4  ;;  %v989_v43 = vrot.slane %v2374_v46, 5  ;;  %v1794_v24 = vrot.slane %v957_v13, 9  ;;  %v961_v4 = vld [vmem:[#allocation2 + $0x3c] sm:$0xe] }
  0x4c   : > { %v693_v26 = vor.u32 %v692_v2, %v688_v17  ;;  %v1786_v27 = vcombine.low %v2471_v11, %v2484_v53  ;;  %v670_v30 = vrot.slane %v669_v14, 4  ;;  %v1800_v33 = vcombine.low %v980_v18, %v983_v19  ;;  %v2571_v18 = vld [vmem:[%s2753_s2] ss:$0 sm:$0xff] }
  0x4d   : > { %v551_v23 = vld [vmem:[#allocation2 + $0x38] sm:$0x1]  ;;  %v1795_v36 = vrot.slane %v958_v45, 9  ;;  %v684_v38 = vrot.slane %v683_v15, 4  ;;  %v996_v22 = vrot.slane %v2467_v32, 5  ;;  %v995_v8 = vrot.slane %v993_v20, 4 }
  0x4e   : > { %1895 = vmatmul.mubr.msk.bf16.gmra.mrb[4].mxu0 %vm720_vm13, %v1784_v28  ;;  %v988_v28 = vrot.slane %v986_v12, 4  ;;  %v672_v31 = vshll.u32 %v551_v23, 16  ;;  %v665_v59 = vsel %vm2387_vm12, %v660_v21, %v664_v9  ;;  %v694_v34 = vrot.slane %v693_v26, 4 }
  0x4f   : > { %1898 = vmatprep.mubr.msk.bf16.mxu0 %vm720_vm13, %v1785_v52  ;;  %v552_v46 = vld [vmem:[#allocation2 + $0x44] sm:$0x1]  ;;  %v987_v11 = vsel %vm2500_vm1, %v1794_v24, %v986_v12  ;;  %v1000_v32 = vrot.slane %v2438_v62, 5  ;;  %v689_v48 = vsel %vm2387_vm12, %v684_v38, %v688_v17  ;;  %v994_v50 = vsel %vm2500_vm1, %v1795_v36, %v993_v20  ;;  %v959_v52 = vld [vmem:[#allocation2 + $0x24] sm:$0xe] }
  0x50   : > { %v674_v39 = vrot.slane %v672_v31, 5  ;;  %v696_v37 = vshll.u32 %v552_v46, 16  ;;  %v990_v40 = vsel %vm2500_vm1, %v988_v28, %v989_v43  ;;  %v997_v51 = vsel %vm2500_vm1, %v995_v8, %v996_v22  ;;  %v960_v62 = vld [vmem:[#allocation2 + $0x30] sm:$0xe]  ;;  %v2576_v20 = vld [vmem:[%s2754_s3] ss:$0 sm:$0xff] }
  0x51   : > { %v1007_v54 = vrot.slane %v2463_v29, 5  ;;  %v1801_v56 = vcombine.low %v987_v11, %v990_v40  ;;  %v1802_v58 = vcombine.low %v994_v50, %v997_v51  ;;  %v1796_v60 = vrot.slane %v959_v52, 9 }
  0x52   : > { %v675_v35 = vsel %vm2387_vm12, %v670_v30, %v674_v39  ;;  %v698_v49 = vrot.slane %v696_v37, 5  ;;  %v1002_v16 = vrot.slane %v1000_v32, 4  ;;  %v1003_v61 = vrot.slane %v2477_v44, 5 }
  0x53   : > { %v1773_v41 = vcombine.low %v665_v59, %v675_v35  ;;  %v1797_v47 = vrot.slane %v960_v62, 9  ;;  %v1009_v25 = vrot.slane %v1007_v54, 4  ;;  %v1010_v0 = vrot.slane %v551_v23, 5 }
  0x54   : > { %v699_v55 = vsel %vm2387_vm12, %v694_v34, %v698_v49  ;;  %v1001_v63 = vsel %vm2500_vm1, %v1796_v60, %v1000_v32  ;;  %v1004_v29 = vsel %vm2500_vm1, %v1002_v16, %v1003_v61  ;;  %v1014_v1 = vrot.slane %v2484_v53, 5 }
  0x55   : > { %1884 = vmatprep.mubr.msk.bf16.mxu1 %vm720_vm13, %v1773_v41  ;;  %v1774_v57 = vcombine.low %v689_v48, %v699_v55  ;;  %v1008_v44 = vsel %vm2500_vm1, %v1797_v47, %v1007_v54  ;;  %v1011_v3 = vsel %vm2500_vm1, %v1009_v25, %v1010_v0  ;;  %v1803_v5 = vcombine.low %v1001_v63, %v1004_v29 }
  0x56   : > { %1899 = vmatmul.mubr.msk.bf16.gmra.mrb[8].mxu0 %vm720_vm13, %v1786_v27  ;;  %v1804_v6 = vcombine.low %v1008_v44, %v1011_v3  ;;  %v1798_v42 = vrot.slane %v961_v4, 9  ;;  %v1016_v9 = vrot.slane %v1014_v1, 4  ;;  %v1017_v10 = vrot.slane %v552_v46, 5 }
  0x57   : > { %1904 = vmatprep.mubr.msk.bf16.mxu0 %vm720_vm13, %v1800_v33  ;;  %1885 = vmatmul.mubr.msk.bf16.gmra.mrb[4].mxu1 %vm720_vm13, %v1774_v57 }
  0x58   : > { %v1015_v53 = vsel %vm2500_vm1, %v1798_v42, %v1014_v1  ;;  %v1018_v12 = vsel %vm2500_vm1, %v1016_v9, %v1017_v10 }
  0x59   : > { %v1805_v13 = vcombine.low %v1015_v53, %v1018_v12 }
  0x5e   : > { %1905 = vmatmul.mubr.msk.bf16.vlgmr.msra.gmra.mrb[0].mxu0 %vm720_vm13, %v1801_v56 }
  0x5f   : > { %1908 = vmatprep.mubr.msk.bf16.mxu0 %vm720_vm13, %v1802_v58 }
  0x66   : > { %1909 = vmatmul.mubr.msk.bf16.gmra.mrb[4].mxu0 %vm720_vm13, %v1803_v5 }
  0x67   : > { %1912 = vmatprep.mubr.msk.bf16.mxu0 %vm720_vm13, %v1804_v6 }
  0x6e   : > { %1913 = vmatmul.mubr.msk.bf16.gmra.mrb[8].mxu0 %vm720_vm13, %v1805_v13 }
 0x11e   : > { %v1882_v2 = vpop.f32.mrb[0].mxu1 }
 0x11f   : > { %v793_v14 = vpop.f32.mrb[1].mxu1 }
 0x120   : > { %v1883_v15 = vpop.f32.mrb[2].mxu1 }
 0x121   : > { %v796_v17 = vpop.f32.mrb[3].mxu1 }
 0x12a   : > { %v1886_v7 = vpop.f32.mrb[4].mxu1 }
 0x12b   : > { %v809_v19 = vpop.f32.mrb[5].mxu1 }
 0x12c   : > { %v1887_v21 = vpop.f32.mrb[6].mxu1 }
 0x12d   : > { %v2579_v23 = vpop.f32.mrb[7].mxu1 }
 0x131   : > { %v1906_v45 = vpop.f32.mrb[0].mxu0 }
 0x132   : > { %v1162_v43 = vmul.f32 %v1906_v45, %v2571_v18  ;;  %v1094_v24 = vpop.f32.mrb[1].mxu0 }
 0x133   : > { %v1160_v26 = vmul.f32 %v2571_v18, %v1094_v24  ;;  %v1907_v27 = vpop.f32.mrb[2].mxu0 }
 0x134   : > { %v2583_v28 = vadd.f32 %v2576_v20, %v1162_v43  ;;  %v1163_v30 = vmul.f32 %v1907_v27, %v2571_v18  ;;  %v1097_v31 = vpop.f32.mrb[3].mxu0 }
 0x135   : > { %v2587_v33 = vadd.f32 %v2576_v20, %v1160_v26  ;;  %v1161_v36 = vmul.f32 %v2571_v18, %v1097_v31 }
 0x136   : > { %v1193_v38 = vsub.f32 0.0, %v2583_v28  ;;  %v2592_v22 = vadd.f32 %v2576_v20, %v1163_v30 }
 0x137   : > { %v1191_v8 = vsub.f32 0.0, %v2587_v33  ;;  %v2596_v59 = vadd.f32 %v2576_v20, %v1161_v36 }
 0x138   : > { %v1207_v39 = vmul.f32 1.442695, %v1193_v38  ;;  %v1194_v46 = vsub.f32 0.0, %v2592_v22 }
 0x139   : > { %v1203_v34 = vmul.f32 1.442695, %v1191_v8  ;;  %v1192_v37 = vsub.f32 0.0, %v2596_v59  ;;  %v1910_v11 = vpop.f32.mrb[4].mxu0 }
 0x13a   : > { %2042 = vpow2.f32 %v1207_v39  ;;  %v1209_v40 = vmul.f32 1.442695, %v1194_v46  ;;  %v1948_v35 = vadd.f32 %v1910_v11, %v1882_v2  ;;  %v1110_v32 = vpop.f32.mrb[5].mxu0 }
 0x13b   : > { %2044 = vpow2.f32 %v1203_v34  ;;  %v1205_v41 = vmul.f32 1.442695, %v1192_v37  ;;  %v1949_v48 = vadd.f32 %v1110_v32, %v793_v14  ;;  %v1911_v49 = vpop.f32.mrb[6].mxu0 }
 0x13c   : > { %2046 = vpow2.f32 %v1209_v40  ;;  %v1166_v50 = vmul.f32 %v1948_v35, %v2571_v18  ;;  %v1950_v51 = vadd.f32 %v1911_v49, %v1883_v15  ;;  %v1113_v52 = vpop.f32.mrb[7].mxu0 }
 0x13d   : > { %2048 = vpow2.f32 %v1205_v41  ;;  %v1164_v54 = vmul.f32 %v1949_v48, %v2571_v18  ;;  %v1951_v55 = vadd.f32 %v1113_v52, %v796_v17 }
 0x13e   : > { %v2603_v62 = vadd.f32 %v2576_v20, %v1166_v50  ;;  %v1167_v56 = vmul.f32 %v1950_v51, %v2571_v18 }
 0x13f   : > { %v2607_v57 = vadd.f32 %v2576_v20, %v1164_v54  ;;  %v1165_v58 = vmul.f32 %v1951_v55, %v2571_v18 }
 0x140   : > { %v1197_v60 = vsub.f32 0.0, %v2603_v62  ;;  %v2612_v16 = vadd.f32 %v2576_v20, %v1167_v56 }
 0x141   : > { %v1195_v61 = vsub.f32 0.0, %v2607_v57  ;;  %v2616_v47 = vadd.f32 %v2576_v20, %v1165_v58  ;;  %v1914_v25 = vpop.f32.mrb[8].mxu0 }
 0x142   : > { %v1215_v0 = vmul.f32 1.442695, %v1197_v60  ;;  %v1198_v63 = vsub.f32 0.0, %v2612_v16  ;;  %v1952_v29 = vadd.f32 %v1914_v25, %v1886_v7  ;;  %v1126_v1 = vpop.f32.mrb[9].mxu0 }
 0x143   : > { %v1211_v44 = vmul.f32 1.442695, %v1195_v61  ;;  %v1196_v3 = vsub.f32 0.0, %v2616_v47  ;;  %v1953_v4 = vadd.f32 %v1126_v1, %v809_v19  ;;  %v1915_v5 = vpop.f32.mrb[10].mxu0 }
 0x144   : > { %v2043_v6 = vpop.eup %2042  ;;  %2050 = vpow2.f32 %v1215_v0  ;;  %v1217_v42 = vmul.f32 1.442695, %v1198_v63  ;;  %v1170_v9 = vmul.f32 %v1952_v29, %v2571_v18  ;;  %v1954_v10 = vadd.f32 %v1915_v5, %v1887_v21  ;;  %v1129_v53 = vpop.f32.mrb[11].mxu0 }
 0x145   : > { %v2045_v12 = vpop.eup %2044  ;;  %v1229_v13 = vadd.f32 1.0, %v2043_v6  ;;  %2052 = vpow2.f32 %v1211_v44  ;;  %v1213_v2 = vmul.f32 1.442695, %v1196_v3  ;;  %v1168_v14 = vmul.f32 %v1953_v4, %v2571_v18 }
 0x146   : > { %v2047_v15 = vpop.eup %2046  ;;  %v1227_v17 = vadd.f32 1.0, %v2045_v12  ;;  %2054 = vpow2.f32 %v1217_v42  ;;  %v2623_v7 = vadd.f32 %v2576_v20, %v1170_v9  ;;  %v1171_v19 = vmul.f32 %v1954_v10, %v2571_v18 }
 0x147   : > { %v2049_v45 = vpop.eup %2048  ;;  %2056 = vrcp.f32 %v1229_v13  ;;  %v1230_v43 = vadd.f32 1.0, %v2047_v15  ;;  %v2627_v21 = vadd.f32 %v2576_v20, %v1168_v14  ;;  %v1955_v24 = vadd.f32 %v1129_v53, %v2579_v23 }
 0x148   : > { %2058 = vrcp.f32 %v1227_v17  ;;  %v1228_v26 = vadd.f32 1.0, %v2049_v45  ;;  %v1201_v27 = vsub.f32 0.0, %v2623_v7  ;;  %v2632_v30 = vadd.f32 %v2576_v20, %v1171_v19 }
 0x149   : > { %2060 = vrcp.f32 %v1230_v43  ;;  %v1199_v31 = vsub.f32 0.0, %v2627_v21  ;;  %v1169_v36 = vmul.f32 %v1955_v24, %v2571_v18 }
 0x14a   : > { %2062 = vrcp.f32 %v1228_v26  ;;  %v1223_v38 = vmul.f32 1.442695, %v1201_v27  ;;  %v1202_v8 = vsub.f32 0.0, %v2632_v30 }
 0x14b   : > { %2064 = vpow2.f32 %v1213_v2  ;;  %v1219_v39 = vmul.f32 1.442695, %v1199_v31  ;;  %v1188_v23 = vadd.f32 %v2576_v20, %v1169_v36 }
 0x14c   : > { %2066 = vpow2.f32 %v1223_v38  ;;  %v1225_v46 = vmul.f32 1.442695, %v1202_v8 }
 0x14d   : > { %2068 = vpow2.f32 %v1219_v39  ;;  %v1200_v34 = vsub.f32 0.0, %v1188_v23 }
 0x14e   : > { %v2051_v37 = vpop.eup %2050  ;;  %2070 = vpow2.f32 %v1225_v46 }
 0x14f   : > { %v2053_v11 = vpop.eup %2052  ;;  %v1233_v40 = vadd.f32 1.0, %v2051_v37  ;;  %v1221_v32 = vmul.f32 1.442695, %v1200_v34 }
 0x150   : > { %v2055_v35 = vpop.eup %2054  ;;  %v1231_v49 = vadd.f32 1.0, %v2053_v11 }
 0x151   : > { %v2057_v41 = vpop.eup %2056  ;;  %2072 = vrcp.f32 %v1233_v40  ;;  %v1234_v18 = vadd.f32 1.0, %v2055_v35 }
 0x152   : > { %v2059_v48 = vpop.eup %2058  ;;  %v1253_v20 = vmul.f32 %v2057_v41, %v2583_v28 }
 0x153   : > { %v2061_v50 = vpop.eup %2060  ;;  %2074 = vrcp.f32 %v1234_v18  ;;  %v1251_v55 = vmul.f32 %v2059_v48, %v2587_v33 }
 0x154   : > { %v2063_v51 = vpop.eup %2062  ;;  %v1254_v52 = vmul.f32 %v2061_v50, %v2592_v22  ;;  %2076 = vpow2.f32 %v1221_v32 }
 0x155   : > { %v2065_v54 = vpop.eup %2064  ;;  %v1252_v56 = vmul.f32 %v2063_v51, %v2596_v59  ;;  %2078 = vrcp.f32 %v1231_v49 }
 0x156   : > { %v2067_v58 = vpop.eup %2066  ;;  %v1264_v60 = vpack.c.bf16 %v1254_v52, %v1253_v20  ;;  %v1232_v61 = vadd.f32 1.0, %v2065_v54 }
 0x157   : > { %v2069_v25 = vpop.eup %2068  ;;  %v1263_v0 = vpack.c.bf16 %v1252_v56, %v1251_v55  ;;  %v1237_v63 = vadd.f32 1.0, %v2067_v58 }
 0x158   : > { %v2071_v29 = vpop.eup %2070  ;;  %2080 = vrcp.f32 %v1232_v61  ;;  %v1235_v44 = vadd.f32 1.0, %v2069_v25  ;;  %1276 = vst.msk [vmem:[#allocation3 + $0x8] sm:$0xff] (!%p2564_p11), %vm720_vm13, %v1264_v60 }
 0x159   : > { %2082 = vrcp.f32 %v1237_v63  ;;  %v1238_v1 = vadd.f32 1.0, %v2071_v29  ;;  %1275 = vst.msk [vmem:[#allocation3] sm:$0xff] (!%p2564_p11), %vm720_vm13, %v1263_v0 }
 0x15b   : > { %v2073_v28 = vpop.eup %2072  ;;  %2084 = vrcp.f32 %v1238_v1 }
 0x15c   : > { %v1257_v33 = vmul.f32 %v2073_v28, %v2603_v62  ;;  %2086 = vrcp.f32 %v1235_v44 }
 0x15d   : > { %v2075_v22 = vpop.eup %2074 }
 0x15e   : > { %v2077_v3 = vpop.eup %2076  ;;  %v1258_v59 = vmul.f32 %v2075_v22, %v2612_v16 }
 0x15f   : > { %v1236_v4 = vadd.f32 1.0, %v2077_v3  ;;  %v2079_v5 = vpop.eup %2078 }
 0x160   : > { %v1266_v6 = vpack.c.bf16 %v1258_v59, %v1257_v33  ;;  %v1255_v10 = vmul.f32 %v2079_v5, %v2607_v57 }
 0x161   : > { %2088 = vrcp.f32 %v1236_v4 }
 0x162   : > { %v2081_v42 = vpop.eup %2080  ;;  %1278 = vst.msk [vmem:[#allocation3 + $0x18] sm:$0xff] (!%p2564_p11), %vm720_vm13, %v1266_v6 }
 0x163   : > { %v2083_v9 = vpop.eup %2082  ;;  %v1256_v53 = vmul.f32 %v2081_v42, %v2616_v47 }
 0x164   : > { %v1261_v2 = vmul.f32 %v2083_v9, %v2623_v7 }
 0x165   : > { %v2085_v12 = vpop.eup %2084  ;;  %v1265_v13 = vpack.c.bf16 %v1256_v53, %v1255_v10 }
 0x166   : > { %v1262_v14 = vmul.f32 %v2085_v12, %v2632_v30  ;;  %v2087_v15 = vpop.eup %2086 }
 0x167   : > { %v1259_v17 = vmul.f32 %v2087_v15, %v2627_v21  ;;  %1277 = vst.msk [vmem:[#allocation3 + $0x10] sm:$0xff] (!%p2564_p11), %vm720_vm13, %v1265_v13 }
 0x168   : > { %v1268_v62 = vpack.c.bf16 %v1262_v14, %v1261_v2  ;;  %1274 = sbr.rel (%p2564_p11) target bundleno = 369 (0x171), region = 52 }
 0x16a   : > { %1280 = vst.msk [vmem:[#allocation3 + $0x28] sm:$0xff] (!%p2564_p11), %vm720_vm13, %v1268_v62 }
 0x16b   : > { %v2089_v16 = vpop.eup %2088 }
 0x16c   : > { %v1260_v19 = vmul.f32 %v2089_v16, %v1188_v23 }
 0x16e   : > { %v1267_v45 = vpack.c.bf16 %v1260_v19, %v1259_v17 }
 0x170   : > { %1279 = vst.msk [vmem:[#allocation3 + $0x20] sm:$0xff] %vm720_vm13, %v1267_v45 }
 0x171 PF: > { %p1814_p12 = scmp.ne.s32.totalorder %s2144_s24, 0 }
 0x172   : > { %1287 = vst.msk [vmem:[#allocation3 + $0x8] sm:$0xff] (!%p1814_p12), %vm720_vm13, %v1263_v0  ;;  %1288 = vst.msk [vmem:[#allocation3 + $0x10] sm:$0xff] (!%p1814_p12), %vm720_vm13, %v1264_v60  ;;  %v2162_v57 = vmov (!%p1814_p12), 0  }
 0x173   : > { %1284 = sbr.rel (%p1814_p12) target bundleno = 378 (0x17a), region = 56  ;;  %1289 = vst.msk [vmem:[#allocation3 + $0x18] sm:$0xff] (!%p1814_p12), %vm720_vm13, %v1265_v13  ;;  %1290 = vst.msk [vmem:[#allocation3 + $0x20] sm:$0xff] (!%p1814_p12), %vm720_vm13, %v1266_v6 }
 0x174   : > { %1291 = vst.msk [vmem:[#allocation3 + $0x28] sm:$0xff] (!%p1814_p12), %vm720_vm13, %v1267_v45  ;;  %1285 = vst.msk [vmem:[#allocation3] sm:$0xff] (!%p1814_p12), %vm720_vm13, %v2162_v57 }
 0x17a PF: > { %p1815_p13 = scmp.ne.s32.totalorder %s2144_s24, 3 }
 0x17b   : > { %1296 = vst.msk [vmem:[#allocation3] sm:$0xff] (!%p1815_p13), %vm720_vm13, %v1264_v60  ;;  %1297 = vst.msk [vmem:[#allocation3 + $0x8] sm:$0xff] (!%p1815_p13), %vm720_vm13, %v1265_v13  ;;  %v2163_v47 = vmov (!%p1815_p13), 0  }
 0x17c   : > { %1295 = sbr.rel (%p1815_p13) target bundleno = 387 (0x183), region = 60  ;;  %1298 = vst.msk [vmem:[#allocation3 + $0x10] sm:$0xff] (!%p1815_p13), %vm720_vm13, %v1266_v6  ;;  %1299 = vst.msk [vmem:[#allocation3 + $0x18] sm:$0xff] (!%p1815_p13), %vm720_vm13, %v1267_v45 }
 0x17d   : > { %1300 = vst.msk [vmem:[#allocation3 + $0x20] sm:$0xff] (!%p1815_p13), %vm720_vm13, %v1268_v62  ;;  %1302 = vst.msk [vmem:[#allocation3 + $0x28] sm:$0xff] (!%p1815_p13), %vm720_vm13, %v2163_v47 }
 0x183 PF: > { %v1816_v7 = vld [vmem:[%s2755_s4 + $0x2] sm:$0x3]  ;;  %v1309_v43 = vld [vmem:[#allocation3 + $0x8] sm:$0xff]  ;;  %v1307_v24 = vld [vmem:[%s2755_s4] sm:$0x3] }
 0x184   : > { %1992 = vmatprep.subr.msk.bf16.mxu1 %vm739_vm0, %v1816_v7  ;;  %v1328_v21 = vsel %vm739_vm0, %v1816_v7, 0  ;;  %1918 = vmatprep.mubr.msk.bf16.mxu1 %vm720_vm13, %v1309_v43  ;;  %v1310_v26 = vld [vmem:[#allocation3 + $0x10] sm:$0xff]  ;;  %v1408_v27 = vsel %vm739_vm0, %v1307_v24, 0  ;;  %v1311_v30 = vld [vmem:[#allocation3 + $0x18] sm:$0xff]  ;;  %v1312_v36 = vld [vmem:[#allocation3 + $0x20] sm:$0xff] }
 0x185   : > { %1917 = vmatpush3.bf16.msra.mxu1 %v1328_v21  ;;  %v1825_v31 = vld [vmem:[%s2755_s4 + $0x4] sm:$0x3]  ;;  %v1303_v38 = vld [vmem:[#allocation3] sm:$0xff]  ;;  %v1479_v39 = vld [vmem:[#allocation3 + $0x28] sm:$0xff] }
 0x186   : > { %1993 = vmatprep.subr.msk.bf16.mxu1 %vm739_vm0, %v1307_v24  ;;  %v1495_v8 = vsel %vm739_vm0, %v1825_v31, 0  ;;  %v1830_v23 = vld [vmem:[%s2756_s5] ss:$0 sm:$0xff] }
 0x187   : > { %v1831_v34 = vld [vmem:[%s2757_s6] ss:$0 sm:$0xff] }
 0x188   : > { %1919 = vmatmul.mubr.msk.bf16.vlgmr.msra.gmra.mrb[8].mxu1 %vm720_vm13, %v1310_v26 }
 0x189   : > { %1927 = vmatpush3.bf16.msra.mxu1 %v1408_v27  ;;  %1922 = vmatprep.mubr.msk.bf16.mxu1 %vm720_vm13, %v1311_v30 }
 0x18a   : > { %1994 = vmatprep.subr.msk.bf16.mxu1 %vm739_vm0, %v1825_v31 }
 0x190   : > { %1923 = vmatmul.mubr.msk.bf16.gmra.mrb[12].mxu1 %vm720_vm13, %v1312_v36 }
 0x191   : > { %1928 = vmatprep.mubr.msk.bf16.mxu1 %vm720_vm13, %v1303_v38 }
 0x198   : > { %1929 = vmatmul.mubr.msk.bf16.vlgmr.msra.gmra.mrb[8].mxu1 %vm720_vm13, %v1309_v43 }
 0x199   : > { %1937 = vmatpush3.bf16.msra.mxu1 %v1495_v8  ;;  %1932 = vmatprep.mubr.msk.bf16.mxu1 %vm720_vm13, %v1310_v26 }
 0x1a0   : > { %1933 = vmatmul.mubr.msk.bf16.gmra.mrb[12].mxu1 %vm720_vm13, %v1311_v30 }
 0x1a1   : > { %1938 = vmatprep.mubr.msk.bf16.mxu1 %vm720_vm13, %v1310_v26 }
 0x1a8   : > { %1939 = vmatmul.mubr.msk.bf16.vlgmr.msra.gmra.mrb[8].mxu1 %vm720_vm13, %v1311_v30 }
 0x1a9   : > { %1942 = vmatprep.mubr.msk.bf16.mxu1 %vm720_vm13, %v1312_v36 }
 0x1b0   : > { %1943 = vmatmul.mubr.msk.bf16.gmra.mrb[12].mxu1 %vm720_vm13, %v1479_v39 }
 0x27b   : > { %v1940_v46 = vpop.f32.mrb[8].mxu1 }
 0x27c   : > { %v1579_v37 = vmul.f32 %v1940_v46, %v1830_v23  ;;  %v1531_v11 = vpop.f32.mrb[9].mxu1 }
 0x27d   : > { %v1577_v40 = vmul.f32 %v1830_v23, %v1531_v11  ;;  %v1941_v35 = vpop.f32.mrb[10].mxu1 }
 0x27e   : > { %v2704_v32 = vadd.f32 %v1831_v34, %v1579_v37  ;;  %v1580_v41 = vmul.f32 %v1941_v35, %v1830_v23  ;;  %v1534_v18 = vpop.f32.mrb[11].mxu1 }
 0x27f   : > { %v2706_v48 = vadd.f32 %v1831_v34, %v1577_v40  ;;  %v1578_v49 = vmul.f32 %v1830_v23, %v1534_v18 }
 0x280   : > { %v1602_v50 = vsub.f32 0.0, %v2704_v32  ;;  %v2709_v51 = vadd.f32 %v1831_v34, %v1580_v41 }
 0x281   : > { %v1600_v20 = vsub.f32 0.0, %v2706_v48  ;;  %v2712_v52 = vadd.f32 %v1831_v34, %v1578_v49 }
 0x282   : > { %v1612_v54 = vmul.f32 1.442695, %v1602_v50  ;;  %v1603_v55 = vsub.f32 0.0, %v2709_v51 }
 0x283   : > { %v1608_v56 = vmul.f32 1.442695, %v1600_v20  ;;  %v1601_v58 = vsub.f32 0.0, %v2712_v52  ;;  %v1944_v60 = vpop.f32.mrb[12].mxu1 }
 0x284   : > { %2090 = vpow2.f32 %v1612_v54  ;;  %v1614_v61 = vmul.f32 1.442695, %v1603_v55  ;;  %v1583_v25 = vmul.f32 %v1944_v60, %v1830_v23  ;;  %v1547_v0 = vpop.f32.mrb[13].mxu1 }
 0x285   : > { %2092 = vpow2.f32 %v1608_v56  ;;  %v1610_v63 = vmul.f32 1.442695, %v1601_v58  ;;  %v1581_v29 = vmul.f32 %v1830_v23, %v1547_v0  ;;  %v1945_v1 = vpop.f32.mrb[14].mxu1 }
 0x286   : > { %2094 = vpow2.f32 %v1614_v61  ;;  %v1598_v28 = vadd.f32 %v1831_v34, %v1583_v25  ;;  %v1584_v44 = vmul.f32 %v1945_v1, %v1830_v23  ;;  %v1550_v22 = vpop.f32.mrb[15].mxu1 }
 0x287   : > { %2096 = vpow2.f32 %v1610_v63  ;;  %v1596_v3 = vadd.f32 %v1831_v34, %v1581_v29  ;;  %v1582_v33 = vmul.f32 %v1830_v23, %v1550_v22 }
 0x288   : > { %v1606_v59 = vsub.f32 0.0, %v1598_v28  ;;  %v1599_v4 = vadd.f32 %v1831_v34, %v1584_v44 }
 0x289   : > { %v1604_v5 = vsub.f32 0.0, %v1596_v3  ;;  %v1597_v6 = vadd.f32 %v1831_v34, %v1582_v33 }
 0x28a   : > { %v1620_v42 = vmul.f32 1.442695, %v1606_v59  ;;  %v1607_v9 = vsub.f32 0.0, %v1599_v4 }
 0x28b   : > { %v1616_v10 = vmul.f32 1.442695, %v1604_v5  ;;  %v1605_v53 = vsub.f32 0.0, %v1597_v6 }
 0x28c   : > { %2098 = vpow2.f32 %v1620_v42  ;;  %v1622_v12 = vmul.f32 1.442695, %v1607_v9 }
 0x28d   : > { %2100 = vpow2.f32 %v1616_v10  ;;  %v1618_v13 = vmul.f32 1.442695, %v1605_v53 }
 0x28e   : > { %v2091_v2 = vpop.eup %2090  ;;  %2102 = vpow2.f32 %v1622_v12 }
 0x28f   : > { %v2093_v14 = vpop.eup %2092  ;;  %v1626_v62 = vadd.f32 1.0, %v2091_v2  ;;  %2104 = vpow2.f32 %v1618_v13 }
 0x290   : > { %v2095_v15 = vpop.eup %2094  ;;  %v1624_v16 = vadd.f32 1.0, %v2093_v14 }
 0x291   : > { %v2097_v17 = vpop.eup %2096  ;;  %2106 = vrcp.f32 %v1626_v62  ;;  %v1627_v19 = vadd.f32 1.0, %v2095_v15 }
 0x292   : > { %2108 = vrcp.f32 %v1624_v16  ;;  %v1625_v45 = vadd.f32 1.0, %v2097_v17 }
 0x293   : > { %2110 = vrcp.f32 %v1627_v19 }
 0x294   : > { %2112 = vrcp.f32 %v1625_v45 }
 0x296   : > { %v2099_v57 = vpop.eup %2098 }
 0x297   : > { %v2101_v47 = vpop.eup %2100  ;;  %v1630_v7 = vadd.f32 1.0, %v2099_v57 }
 0x298   : > { %v2103_v43 = vpop.eup %2102  ;;  %v1628_v21 = vadd.f32 1.0, %v2101_v47 }
 0x299   : > { %v2105_v24 = vpop.eup %2104  ;;  %2114 = vrcp.f32 %v1630_v7  ;;  %v1631_v26 = vadd.f32 1.0, %v2103_v43 }
 0x29a   : > { %2116 = vrcp.f32 %v1628_v21  ;;  %v1629_v27 = vadd.f32 1.0, %v2105_v24 }
 0x29b   : > { %v2107_v30 = vpop.eup %2106  ;;  %2118 = vrcp.f32 %v1631_v26 }
 0x29c   : > { %v2109_v31 = vpop.eup %2108  ;;  %v1642_v36 = vmul.f32 %v2107_v30, %v2704_v32  ;;  %2120 = vrcp.f32 %v1629_v27 }
 0x29d   : > { %v2111_v38 = vpop.eup %2110  ;;  %v1640_v8 = vmul.f32 %v2109_v31, %v2706_v48 }
 0x29e   : > { %v2113_v39 = vpop.eup %2112  ;;  %1650 = vst.msk [vmem:[%s2281_s21 + $0x10] sm:$0xff] %vm720_vm13, %v1642_v36  ;;  %v1643_v23 = vmul.f32 %v2111_v38, %v2709_v51 }
 0x29f   : > { %1648 = vst.msk [vmem:[%s2281_s21] sm:$0xff] %vm720_vm13, %v1640_v8  ;;  %v1641_v46 = vmul.f32 %v2113_v39, %v2712_v52 }
 0x2a0   : > { %1651 = vst.msk [vmem:[%s2281_s21 + $0x18] sm:$0xff] %vm720_vm13, %v1643_v23 }
 0x2a1   : > { %1649 = vst.msk [vmem:[%s2281_s21 + $0x8] sm:$0xff] %vm720_vm13, %v1641_v46 }
 0x2a3   : > { %v2115_v34 = vpop.eup %2114 }
 0x2a4   : > { %v2117_v37 = vpop.eup %2116  ;;  %v1646_v11 = vmul.f32 %v2115_v34, %v1598_v28 }
 0x2a5   : > { %v2119_v40 = vpop.eup %2118  ;;  %v1644_v35 = vmul.f32 %v2117_v37, %v1596_v3 }
 0x2a6   : > { %v2121_v32 = vpop.eup %2120  ;;  %1654 = vst.msk [vmem:[%s2281_s21 + $0x30] sm:$0xff] %vm720_vm13, %v1646_v11  ;;  %v1647_v41 = vmul.f32 %v2119_v40, %v1599_v4 }
 0x2a7   : > { %1652 = vst.msk [vmem:[%s2281_s21 + $0x20] sm:$0xff] %vm720_vm13, %v1644_v35  ;;  %v1645_v18 = vmul.f32 %v2121_v32, %v1597_v6 }
 0x2a8   : > { %1655 = vst.msk [vmem:[%s2281_s21 + $0x38] sm:$0xff] %vm720_vm13, %v1647_v41 }
 0x2a9   : > { %1653 = vst.msk [vmem:[%s2281_s21 + $0x28] sm:$0xff] %vm720_vm13, %v1645_v18 }
 0x2aa PF: > { %s17_s28 = sadd.s32 1, %s2160_s28   ;;  %s2772_s24 = smov %s2152_s26 }
 0x2ab   : > { %p14_p0 = scmp.ge.s32.totalorder %s17_s28, 10   ;;  %s2773_s25 = smov %s2156_s27 }
 0x2ac   : > { %s2774_s26 = smov %s2777_s29  ;;  %s2775_s27 = smov %s2781_s30 }
 0x2ad   :  { %16 = sbr.rel (!%p14_p0) target bundleno = 3 (0x3), region = 99 }

</bundles_post_ra>
